<compile_context>
chip_gen: v6e
topology: v6e:2x2x1
jax: 0.10.0
libtpu: 0.0.40
codegen_flags: <defaults>
</compile_context>

<pallas_src>
import jax
import jax.numpy as jnp
import numpy as np
from jax.experimental import pallas as pl
from jax.experimental.pallas import tpu as pltpu

# Model hyper-parameters (LRNet defaults, with a small time dimension)
FEATURE_SIZE = 136     # landmark features
CNN_CHANNELS = 64
KERNEL_SIZE = 3
RNN_UNIT = 32          # H
RES_HIDDEN = 64
NUM_CLASSES = 2

BATCH = 2
FRAMES = 8             # time steps (even, so MaxPool1d(2) -> 4)


def lrnet_kernel(xcol_ref, cw_ref, cb_ref,
                 g_wih_ref, g_whh_ref, g_xb_ref, g_bhhn_ref,
                 l_wih_gf_ref, l_wih_gb_ref, l_whh_ref, l_xb_ref,
                 ff_w1_ref, ff_b1_ref, ff_w2_ref, ff_b2_ref,
                 d_w_ref, d_b_ref,
                 out_ref):
    TB = xcol_ref.shape[0]
    H = g_whh_ref.shape[0]
    B = g_bhhn_ref.shape[0] // 2
    T = TB // B
    Tp = T // 2
    H2, H3, H4 = 2 * H, 3 * H, 4 * H
    f32 = jnp.float32

    # ---- Conv1d(F -> C, k=3, pad=1) + ReLU: one im2col matmul over all (t,b) ----
    conv = jnp.dot(xcol_ref[...], cw_ref[...], preferred_element_type=f32)
    conv = jnp.maximum(conv + cb_ref[...], 0.0)                    # (T*B, C) time-major

    # ---- MaxPool1d(2) over time ----
    C = conv.shape[1]
    conv3 = conv.reshape(Tp, 2 * B, C)                             # block t: [time 2t rows | time 2t+1 rows]
    pooled = jnp.maximum(conv3[:, :B, :], conv3[:, B:, :]).reshape(Tp * B, C)

    # ---- Bidirectional GRU: hoisted gate+direction-fused input projection ----
    gx = jnp.dot(pooled, g_wih_ref[...], preferred_element_type=f32) + g_xb_ref[...]   # (Tp*B, 6H)
    bhh_n = g_bhhn_ref[...]                                        # (2B, H): rows :B fwd, B: bwd

    h = jnp.zeros((2 * B, H), f32)                                 # [h_fwd ; h_bwd]
    gru_f, gru_b = [], []
    for s in range(Tp):
        hh_all = jnp.dot(h, g_whh_ref[...], preferred_element_type=f32)          # (2B, 6H)
        hh = jnp.concatenate([hh_all[:B, :H3], hh_all[B:, H3:]], axis=0)          # (2B, 3H)
        xg = jnp.concatenate([gx[s * B:(s + 1) * B, :H3],
                              gx[(Tp - 1 - s) * B:(Tp - s) * B, H3:]], axis=0)    # (2B, 3H)
        r = jax.nn.sigmoid(xg[:, :H] + hh[:, :H])
        z = jax.nn.sigmoid(xg[:, H:H2] + hh[:, H:H2])
        n = jnp.tanh(xg[:, H2:] + r * (hh[:, H2:] + bhh_n))
        h = (1.0 - z) * n + z * h
        gru_f.append(h[:B])                                        # fwd hidden at time s
        gru_b.append(h[B:])                                        # bwd hidden at time Tp-1-s

    gf_block = jnp.concatenate(gru_f, axis=0)                      # (Tp*B, H) time-major
    gb_block = jnp.concatenate(gru_b[::-1], axis=0)                # (Tp*B, H) time-major

    # ---- Bidirectional LSTM: hoisted fused input projection (biases fully folded) ----
    lx = (jnp.dot(gf_block, l_wih_gf_ref[...], preferred_element_type=f32)
          + jnp.dot(gb_block, l_wih_gb_ref[...], preferred_element_type=f32)
          + l_xb_ref[...])                                         # (Tp*B, 8H)

    h = jnp.zeros((2 * B, H), f32)
    c = jnp.zeros((2 * B, H), f32)
    lstm_b_last = None
    for s in range(Tp):
        hh_all = jnp.dot(h, l_whh_ref[...], preferred_element_type=f32)           # (2B, 8H)
        hh = jnp.concatenate([hh_all[:B, :H4], hh_all[B:, H4:]], axis=0)           # (2B, 4H)
        xg = jnp.concatenate([lx[s * B:(s + 1) * B, :H4],
                              lx[(Tp - 1 - s) * B:(Tp - s) * B, H4:]], axis=0)     # (2B, 4H)
        gates = xg + hh
        i = jax.nn.sigmoid(gates[:, :H])
        f = jax.nn.sigmoid(gates[:, H:H2])
        g = jnp.tanh(gates[:, H2:H3])
        o = jax.nn.sigmoid(gates[:, H3:])
        c = f * c + i * g
        h = o * jnp.tanh(c)
        if s == 0:
            lstm_b_last = h[B:]                                    # bwd hidden at last time index

    # lstm_out[:, -1, :] == concat(forward final state, backward state at last index)
    v = jnp.concatenate([h[:B], lstm_b_last], axis=1)              # (B, 2H)

    # ---- Residual FeedForward (dropouts identity in eval mode) ----
    h1 = jnp.maximum(jnp.dot(v, ff_w1_ref[...], preferred_element_type=f32) + ff_b1_ref[...], 0.0)
    y = jnp.dot(h1, ff_w2_ref[...], preferred_element_type=f32) + ff_b2_ref[...] + v

    # ---- Dense(2H -> 2) + Softmax(dim=1) ----
    logits = jnp.dot(y, d_w_ref[...], preferred_element_type=f32) + d_b_ref[...]
    m = jnp.max(logits, axis=1, keepdims=True)
    e = jnp.exp(logits - m)
    out_ref[...] = e / jnp.sum(e, axis=1, keepdims=True)


def lrnet_forward(x, params):
    """x: (B, T, F) float32  ->  (B, 2) softmax probabilities."""
    B, T, F = x.shape
    H = RNN_UNIT
    K = KERNEL_SIZE
    C = CNN_CHANNELS
    pad = K // 2

    # --- host-side glue: im2col, time-major rows (row index = t*B + b) ---
    xp = jnp.pad(x, ((0, 0), (pad, pad), (0, 0)))
    xcol = jnp.concatenate([xp[:, k:k + T, :] for k in range(K)], axis=-1)   # (B, T, K*F)
    xcol = jnp.transpose(xcol, (1, 0, 2)).reshape(T * B, K * F)

    # --- host-side param fusion ---
    conv_w = params["cw"].reshape(K * F, C)          # (K*F, C), matches im2col column order
    conv_b = params["cb"]                            # (1, C)

    def fuse_gru(wih, whh, bih, bhh):
        w_ih = jnp.transpose(wih, (1, 0, 2)).reshape(wih.shape[1], 3 * H)
        w_hh = jnp.transpose(whh, (1, 0, 2)).reshape(H, 3 * H)
        b_ih = bih.reshape(1, 3 * H)
        b_hh = bhh.reshape(1, 3 * H)
        # fold bhh for r,z into the input-side bias; bhh_n must stay inside r*(...)
        xbias = b_ih + jnp.concatenate([b_hh[:, :2 * H], jnp.zeros((1, H), jnp.float32)], axis=1)
        return w_ih, w_hh, xbias, b_hh[:, 2 * H:]

    gwf, ghf, gxf, gnf = fuse_gru(params["g_wih_f"], params["g_whh_f"],
                                  params["g_bih_f"], params["g_bhh_f"])
    gwb, ghb, gxb, gnb = fuse_gru(params["g_wih_b"], params["g_whh_b"],
                                  params["g_bih_b"], params["g_bhh_b"])
    g_wih = jnp.concatenate([gwf, gwb], axis=1)      # (C, 6H)
    g_whh = jnp.concatenate([ghf, ghb], axis=1)      # (H, 6H)
    g_xb = jnp.concatenate([gxf, gxb], axis=1)       # (1, 6H)
    g_bhhn = jnp.concatenate([jnp.tile(gnf, (B, 1)), jnp.tile(gnb, (B, 1))], axis=0)  # (2B, H)

    def fuse_lstm(wih, whh, bih, bhh):
        w_ih = jnp.transpose(wih, (1, 0, 2)).reshape(wih.shape[1], 4 * H)
        w_hh = jnp.transpose(whh, (1, 0, 2)).reshape(H, 4 * H)
        xbias = bih.reshape(1, 4 * H) + bhh.reshape(1, 4 * H)       # fully foldable
        return w_ih, w_hh, xbias

    lwf, lhf, lxf = fuse_lstm(params["l_wih_f"], params["l_whh_f"],
                              params["l_bih_f"], params["l_bhh_f"])
    lwb, lhb, lxb = fuse_lstm(params["l_wih_b"], params["l_whh_b"],
                              params["l_bih_b"], params["l_bhh_b"])
    l_wih = jnp.concatenate([lwf, lwb], axis=1)      # (2H, 8H)
    l_wih_gf = l_wih[:H]                             # (H, 8H)  acts on GRU-forward half
    l_wih_gb = l_wih[H:]                             # (H, 8H)  acts on GRU-backward half
    l_whh = jnp.concatenate([lhf, lhb], axis=1)      # (H, 8H)
    l_xb = jnp.concatenate([lxf, lxb], axis=1)       # (1, 8H)

    args = [xcol, conv_w, conv_b,
            g_wih, g_whh, g_xb, g_bhhn,
            l_wih_gf, l_wih_gb, l_whh, l_xb,
            params["ff_w1"], params["ff_b1"], params["ff_w2"], params["ff_b2"],
            params["d_w"], params["d_b"]]

    def full_spec(a):
        n = a.ndim
        return pl.BlockSpec(a.shape, lambda i, _n=n: (0,) * _n)

    return pl.pallas_call(
        lrnet_kernel,
        out_shape=jax.ShapeDtypeStruct((B, NUM_CLASSES), jnp.float32),
        grid=(1,),
        in_specs=[full_spec(a) for a in args],
        out_specs=pl.BlockSpec((B, NUM_CLASSES), lambda i: (0, 0)),
        compiler_params=pltpu.CompilerParams(dimension_semantics=("arbitrary",)),
    )(*args)


def ref_forward(x, p):
    """Pure-JAX reference mirroring LRNet.forward (eval mode), on unfused params."""
    B, T, F = x.shape
    pad = KERNEL_SIZE // 2
    H = RNN_UNIT
    xp = jnp.pad(x, ((0, 0), (pad, pad), (0, 0)))
    acc = jnp.zeros((B, T, CNN_CHANNELS), jnp.float32)
    for k in range(KERNEL_SIZE):
        acc = acc + jnp.einsum("btf,fc->btc", xp[:, k:k + T, :], p["cw"][k])
    conv = jax.nn.relu(acc + p["cb"][None])
    pooled = jnp.maximum(conv[:, 0::2, :], conv[:, 1::2, :])   # (B, Tp, C)
    Tp = pooled.shape[1]

    def gru_cell(x_t, h, wih, whh, bih, bhh):
        r = jax.nn.sigmoid(x_t @ wih[0] + bih[0] + h @ whh[0] + bhh[0])
        z = jax.nn.sigmoid(x_t @ wih[1] + bih[1] + h @ whh[1] + bhh[1])
        n = jnp.tanh(x_t @ wih[2] + bih[2] + r * (h @ whh[2] + bhh[2]))
        return (1 - z) * n + z * h

    def lstm_cell(x_t, h, c, wih, whh, bih, bhh):
        i = jax.nn.sigmoid(x_t @ wih[0] + bih[0] + h @ whh[0] + bhh[0])
        f = jax.nn.sigmoid(x_t @ wih[1] + bih[1] + h @ whh[1] + bhh[1])
        g = jnp.tanh(x_t @ wih[2] + bih[2] + h @ whh[2] + bhh[2])
        o = jax.nn.sigmoid(x_t @ wih[3] + bih[3] + h @ whh[3] + bhh[3])
        c = f * c + i * g
        return o * jnp.tanh(c), c

    h = jnp.zeros((B, H)); gru_f = []
    for t in range(Tp):
        h = gru_cell(pooled[:, t], h, p["g_wih_f"], p["g_whh_f"], p["g_bih_f"], p["g_bhh_f"])
        gru_f.append(h)
    h = jnp.zeros((B, H)); gru_b = [None] * Tp
    for t in range(Tp - 1, -1, -1):
        h = gru_cell(pooled[:, t], h, p["g_wih_b"], p["g_whh_b"], p["g_bih_b"], p["g_bhh_b"])
        gru_b[t] = h
    gru_out = [jnp.concatenate([gru_f[t], gru_b[t]], axis=1) for t in range(Tp)]

    h = jnp.zeros((B, H)); c = jnp.zeros((B, H))
    for t in range(Tp):
        h, c = lstm_cell(gru_out[t], h, c, p["l_wih_f"], p["l_whh_f"], p["l_bih_f"], p["l_bhh_f"])
    lstm_f_last = h
    h = jnp.zeros((B, H)); c = jnp.zeros((B, H)); lstm_b = [None] * Tp
    for t in range(Tp - 1, -1, -1):
        h, c = lstm_cell(gru_out[t], h, c, p["l_wih_b"], p["l_whh_b"], p["l_bih_b"], p["l_bhh_b"])
        lstm_b[t] = h
    v = jnp.concatenate([lstm_f_last, lstm_b[Tp - 1]], axis=1)

    h1 = jax.nn.relu(v @ p["ff_w1"] + p["ff_b1"])
    y = h1 @ p["ff_w2"] + p["ff_b2"] + v
    logits = y @ p["d_w"] + p["d_b"]
    return jax.nn.softmax(logits, axis=1)


if __name__ == "__main__":
    key = jax.random.PRNGKey(0)
    keys = iter(jax.random.split(key, 32))

    def nrm(shape, scale=0.1):
        return jax.random.normal(next(keys), shape, jnp.float32) * scale

    H, C, F = RNN_UNIT, CNN_CHANNELS, FEATURE_SIZE
    params = {
        # Conv1d: weights pre-transposed to (k, in, out); bias (1, out)
        "cw": nrm((KERNEL_SIZE, F, C)),
        "cb": nrm((1, C)),
        # GRU (bidirectional): gate-split weights (3, in, H), (3, H, H), biases (3, 1, H)
        "g_wih_f": nrm((3, C, H)), "g_whh_f": nrm((3, H, H)),
        "g_bih_f": nrm((3, 1, H)), "g_bhh_f": nrm((3, 1, H)),
        "g_wih_b": nrm((3, C, H)), "g_whh_b": nrm((3, H, H)),
        "g_bih_b": nrm((3, 1, H)), "g_bhh_b": nrm((3, 1, H)),
        # LSTM (bidirectional): gate-split weights (4, 2H, H), (4, H, H), biases (4, 1, H)
        "l_wih_f": nrm((4, 2 * H, H)), "l_whh_f": nrm((4, H, H)),
        "l_bih_f": nrm((4, 1, H)), "l_bhh_f": nrm((4, 1, H)),
        "l_wih_b": nrm((4, 2 * H, H)), "l_whh_b": nrm((4, H, H)),
        "l_bih_b": nrm((4, 1, H)), "l_bhh_b": nrm((4, 1, H)),
        # Residual FeedForward(2H -> 64 -> 2H)
        "ff_w1": nrm((2 * H, RES_HIDDEN)), "ff_b1": nrm((1, RES_HIDDEN)),
        "ff_w2": nrm((RES_HIDDEN, 2 * H)), "ff_b2": nrm((1, 2 * H)),
        # Dense(2H -> 2)
        "d_w": nrm((2 * H, NUM_CLASSES)), "d_b": nrm((1, NUM_CLASSES)),
    }
    x = jax.random.normal(next(keys), (BATCH, FRAMES, F), jnp.float32)

    out = jax.block_until_ready(lrnet_forward(x, params))
    ref = jax.block_until_ready(ref_forward(x, params))

    assert out.shape == (BATCH, NUM_CLASSES)
    np.testing.assert_allclose(np.asarray(out), np.asarray(ref), rtol=2e-3, atol=2e-3)
    print("KERNEL_OK")
</pallas_src>

<mosaic_0001>
module attributes {stable_mosaic.version = 11 : i64} {
  func.func @lrnet_kernel(%arg0: i32, %arg1: memref<16x408xf32, #tpu.memory_space<vmem>>, %arg2: memref<408x64xf32, #tpu.memory_space<vmem>>, %arg3: memref<1x64xf32, #tpu.memory_space<vmem>>, %arg4: memref<64x192xf32, #tpu.memory_space<vmem>>, %arg5: memref<32x192xf32, #tpu.memory_space<vmem>>, %arg6: memref<1x192xf32, #tpu.memory_space<vmem>>, %arg7: memref<4x32xf32, #tpu.memory_space<vmem>>, %arg8: memref<32x256xf32, #tpu.memory_space<vmem>>, %arg9: memref<32x256xf32, #tpu.memory_space<vmem>>, %arg10: memref<32x256xf32, #tpu.memory_space<vmem>>, %arg11: memref<1x256xf32, #tpu.memory_space<vmem>>, %arg12: memref<64x64xf32, #tpu.memory_space<vmem>>, %arg13: memref<1x64xf32, #tpu.memory_space<vmem>>, %arg14: memref<64x64xf32, #tpu.memory_space<vmem>>, %arg15: memref<1x64xf32, #tpu.memory_space<vmem>>, %arg16: memref<64x2xf32, #tpu.memory_space<vmem>>, %arg17: memref<1x2xf32, #tpu.memory_space<vmem>>, %arg18: memref<2x2xf32, #tpu.memory_space<vmem>>) attributes {dimension_semantics = [#tpu.dimension_semantics<arbitrary>], iteration_bounds = array<i64: 1>, scalar_prefetch = 0 : i64, scratch_operands = 0 : i64, tpu.core_type = #tpu.core_type<tc>, window_params = [{pipeline_mode = #tpu.pipeline_mode<synchronous>, transform_indices = @transform_0, window_bounds = array<i64: 16, 408>}, {pipeline_mode = #tpu.pipeline_mode<synchronous>, transform_indices = @transform_1, window_bounds = array<i64: 408, 64>}, {pipeline_mode = #tpu.pipeline_mode<synchronous>, transform_indices = @transform_2, window_bounds = array<i64: 1, 64>}, {pipeline_mode = #tpu.pipeline_mode<synchronous>, transform_indices = @transform_3, window_bounds = array<i64: 64, 192>}, {pipeline_mode = #tpu.pipeline_mode<synchronous>, transform_indices = @transform_4, window_bounds = array<i64: 32, 192>}, {pipeline_mode = #tpu.pipeline_mode<synchronous>, transform_indices = @transform_5, window_bounds = array<i64: 1, 192>}, {pipeline_mode = #tpu.pipeline_mode<synchronous>, transform_indices = @transform_6, window_bounds = array<i64: 4, 32>}, {pipeline_mode = #tpu.pipeline_mode<synchronous>, transform_indices = @transform_7, window_bounds = array<i64: 32, 256>}, {pipeline_mode = #tpu.pipeline_mode<synchronous>, transform_indices = @transform_8, window_bounds = array<i64: 32, 256>}, {pipeline_mode = #tpu.pipeline_mode<synchronous>, transform_indices = @transform_9, window_bounds = array<i64: 32, 256>}, {pipeline_mode = #tpu.pipeline_mode<synchronous>, transform_indices = @transform_10, window_bounds = array<i64: 1, 256>}, {pipeline_mode = #tpu.pipeline_mode<synchronous>, transform_indices = @transform_11, window_bounds = array<i64: 64, 64>}, {pipeline_mode = #tpu.pipeline_mode<synchronous>, transform_indices = @transform_12, window_bounds = array<i64: 1, 64>}, {pipeline_mode = #tpu.pipeline_mode<synchronous>, transform_indices = @transform_13, window_bounds = array<i64: 64, 64>}, {pipeline_mode = #tpu.pipeline_mode<synchronous>, transform_indices = @transform_14, window_bounds = array<i64: 1, 64>}, {pipeline_mode = #tpu.pipeline_mode<synchronous>, transform_indices = @transform_15, window_bounds = array<i64: 64, 2>}, {pipeline_mode = #tpu.pipeline_mode<synchronous>, transform_indices = @transform_16, window_bounds = array<i64: 1, 2>}, {pipeline_mode = #tpu.pipeline_mode<synchronous>, transform_indices = @transform_17, window_bounds = array<i64: 2, 2>}]} {
    %c0 = arith.constant 0 : index
    %c0_0 = arith.constant 0 : index
    %0 = vector.load %arg1[%c0, %c0_0] : memref<16x408xf32, #tpu.memory_space<vmem>>, vector<16x408xf32>
    %c0_1 = arith.constant 0 : index
    %c0_2 = arith.constant 0 : index
    %1 = vector.load %arg2[%c0_1, %c0_2] : memref<408x64xf32, #tpu.memory_space<vmem>>, vector<408x64xf32>
    %cst = arith.constant dense<0.000000e+00> : vector<16x64xf32>
    %2 = tpu.matmul %0, %1, %cst {dimension_numbers = #tpu.dot_dimension_numbers<[1], [0], [0], [1], [0, 0, 1, 1], [], []>} : vector<16x408xf32>, vector<408x64xf32>, vector<16x64xf32> -> vector<16x64xf32>
    %c0_3 = arith.constant 0 : index
    %c0_4 = arith.constant 0 : index
    %3 = vector.load %arg3[%c0_3, %c0_4] : memref<1x64xf32, #tpu.memory_space<vmem>>, vector<1x64xf32>
    %4 = vector.broadcast %3 : vector<1x64xf32> to vector<16x64xf32>
    %5 = arith.addf %2, %4 : vector<16x64xf32>
    %cst_5 = arith.constant 0.000000e+00 : f32
    %6 = vector.broadcast %cst_5 : f32 to vector<16x64xf32>
    %7 = arith.maximumf %5, %6 : vector<16x64xf32>
    %8 = vector.shape_cast %7 : vector<16x64xf32> to vector<4x4x64xf32>
    %9 = vector.extract_strided_slice %8 {offsets = [0, 0, 0], sizes = [4, 2, 64], strides = [1, 1, 1]} : vector<4x4x64xf32> to vector<4x2x64xf32>
    %10 = vector.extract_strided_slice %8 {offsets = [0, 2, 0], sizes = [4, 2, 64], strides = [1, 1, 1]} : vector<4x4x64xf32> to vector<4x2x64xf32>
    %11 = arith.maximumf %9, %10 : vector<4x2x64xf32>
    %12 = vector.shape_cast %11 : vector<4x2x64xf32> to vector<8x64xf32>
    %c0_6 = arith.constant 0 : index
    %c0_7 = arith.constant 0 : index
    %13 = vector.load %arg4[%c0_6, %c0_7] : memref<64x192xf32, #tpu.memory_space<vmem>>, vector<64x192xf32>
    %cst_8 = arith.constant dense<0.000000e+00> : vector<8x192xf32>
    %14 = tpu.matmul %12, %13, %cst_8 {dimension_numbers = #tpu.dot_dimension_numbers<[1], [0], [0], [1], [0, 0, 1, 1], [], []>} : vector<8x64xf32>, vector<64x192xf32>, vector<8x192xf32> -> vector<8x192xf32>
    %c0_9 = arith.constant 0 : index
    %c0_10 = arith.constant 0 : index
    %15 = vector.load %arg6[%c0_9, %c0_10] : memref<1x192xf32, #tpu.memory_space<vmem>>, vector<1x192xf32>
    %16 = vector.broadcast %15 : vector<1x192xf32> to vector<8x192xf32>
    %17 = arith.addf %14, %16 : vector<8x192xf32>
    %c0_11 = arith.constant 0 : index
    %c0_12 = arith.constant 0 : index
    %18 = vector.load %arg7[%c0_11, %c0_12] : memref<4x32xf32, #tpu.memory_space<vmem>>, vector<4x32xf32>
    %cst_13 = arith.constant 0.000000e+00 : f32
    %19 = vector.broadcast %cst_13 : f32 to vector<4x32xf32>
    %c0_14 = arith.constant 0 : index
    %c0_15 = arith.constant 0 : index
    %20 = vector.load %arg5[%c0_14, %c0_15] : memref<32x192xf32, #tpu.memory_space<vmem>>, vector<32x192xf32>
    %cst_16 = arith.constant dense<0.000000e+00> : vector<4x192xf32>
    %21 = tpu.matmul %19, %20, %cst_16 {dimension_numbers = #tpu.dot_dimension_numbers<[1], [0], [0], [1], [0, 0, 1, 1], [], []>} : vector<4x32xf32>, vector<32x192xf32>, vector<4x192xf32> -> vector<4x192xf32>
    %22 = vector.extract_strided_slice %21 {offsets = [0, 0], sizes = [2, 96], strides = [1, 1]} : vector<4x192xf32> to vector<2x96xf32>
    %23 = vector.extract_strided_slice %21 {offsets = [2, 96], sizes = [2, 96], strides = [1, 1]} : vector<4x192xf32> to vector<2x96xf32>
    %24 = tpu.concatenate %22, %23 in 0 : vector<2x96xf32>, vector<2x96xf32> -> vector<4x96xf32>
    %25 = vector.extract_strided_slice %17 {offsets = [0, 0], sizes = [2, 96], strides = [1, 1]} : vector<8x192xf32> to vector<2x96xf32>
    %26 = vector.extract_strided_slice %17 {offsets = [6, 96], sizes = [2, 96], strides = [1, 1]} : vector<8x192xf32> to vector<2x96xf32>
    %27 = tpu.concatenate %25, %26 in 0 : vector<2x96xf32>, vector<2x96xf32> -> vector<4x96xf32>
    %28 = vector.extract_strided_slice %27 {offsets = [0, 0], sizes = [4, 32], strides = [1, 1]} : vector<4x96xf32> to vector<4x32xf32>
    %29 = vector.extract_strided_slice %24 {offsets = [0, 0], sizes = [4, 32], strides = [1, 1]} : vector<4x96xf32> to vector<4x32xf32>
    %30 = arith.addf %28, %29 : vector<4x32xf32>
    %31 = arith.negf %30 : vector<4x32xf32>
    %32 = math.exp %31 : vector<4x32xf32>
    %cst_17 = arith.constant 1.000000e+00 : f32
    %33 = vector.broadcast %cst_17 : f32 to vector<4x32xf32>
    %34 = arith.addf %33, %32 : vector<4x32xf32>
    %35 = arith.divf %33, %34 : vector<4x32xf32>
    %36 = vector.extract_strided_slice %27 {offsets = [0, 32], sizes = [4, 32], strides = [1, 1]} : vector<4x96xf32> to vector<4x32xf32>
    %37 = vector.extract_strided_slice %24 {offsets = [0, 32], sizes = [4, 32], strides = [1, 1]} : vector<4x96xf32> to vector<4x32xf32>
    %38 = arith.addf %36, %37 : vector<4x32xf32>
    %39 = arith.negf %38 : vector<4x32xf32>
    %40 = math.exp %39 : vector<4x32xf32>
    %cst_18 = arith.constant 1.000000e+00 : f32
    %41 = vector.broadcast %cst_18 : f32 to vector<4x32xf32>
    %42 = arith.addf %41, %40 : vector<4x32xf32>
    %43 = arith.divf %41, %42 : vector<4x32xf32>
    %44 = vector.extract_strided_slice %27 {offsets = [0, 64], sizes = [4, 32], strides = [1, 1]} : vector<4x96xf32> to vector<4x32xf32>
    %45 = vector.extract_strided_slice %24 {offsets = [0, 64], sizes = [4, 32], strides = [1, 1]} : vector<4x96xf32> to vector<4x32xf32>
    %46 = arith.addf %45, %18 : vector<4x32xf32>
    %47 = arith.mulf %35, %46 : vector<4x32xf32>
    %48 = arith.addf %44, %47 : vector<4x32xf32>
    %49 = math.tanh %48 : vector<4x32xf32>
    %cst_19 = arith.constant 1.000000e+00 : f32
    %50 = vector.broadcast %cst_19 : f32 to vector<4x32xf32>
    %51 = arith.subf %50, %43 : vector<4x32xf32>
    %52 = arith.mulf %51, %49 : vector<4x32xf32>
    %53 = arith.mulf %43, %19 : vector<4x32xf32>
    %54 = arith.addf %52, %53 : vector<4x32xf32>
    %55 = vector.extract_strided_slice %54 {offsets = [0, 0], sizes = [2, 32], strides = [1, 1]} : vector<4x32xf32> to vector<2x32xf32>
    %56 = vector.extract_strided_slice %54 {offsets = [2, 0], sizes = [2, 32], strides = [1, 1]} : vector<4x32xf32> to vector<2x32xf32>
    %c0_20 = arith.constant 0 : index
    %c0_21 = arith.constant 0 : index
    %57 = vector.load %arg5[%c0_20, %c0_21] : memref<32x192xf32, #tpu.memory_space<vmem>>, vector<32x192xf32>
    %cst_22 = arith.constant dense<0.000000e+00> : vector<4x192xf32>
    %58 = tpu.matmul %54, %57, %cst_22 {dimension_numbers = #tpu.dot_dimension_numbers<[1], [0], [0], [1], [0, 0, 1, 1], [], []>} : vector<4x32xf32>, vector<32x192xf32>, vector<4x192xf32> -> vector<4x192xf32>
    %59 = vector.extract_strided_slice %58 {offsets = [0, 0], sizes = [2, 96], strides = [1, 1]} : vector<4x192xf32> to vector<2x96xf32>
    %60 = vector.extract_strided_slice %58 {offsets = [2, 96], sizes = [2, 96], strides = [1, 1]} : vector<4x192xf32> to vector<2x96xf32>
    %61 = tpu.concatenate %59, %60 in 0 : vector<2x96xf32>, vector<2x96xf32> -> vector<4x96xf32>
    %62 = vector.extract_strided_slice %17 {offsets = [2, 0], sizes = [2, 96], strides = [1, 1]} : vector<8x192xf32> to vector<2x96xf32>
    %63 = vector.extract_strided_slice %17 {offsets = [4, 96], sizes = [2, 96], strides = [1, 1]} : vector<8x192xf32> to vector<2x96xf32>
    %64 = tpu.concatenate %62, %63 in 0 : vector<2x96xf32>, vector<2x96xf32> -> vector<4x96xf32>
    %65 = vector.extract_strided_slice %64 {offsets = [0, 0], sizes = [4, 32], strides = [1, 1]} : vector<4x96xf32> to vector<4x32xf32>
    %66 = vector.extract_strided_slice %61 {offsets = [0, 0], sizes = [4, 32], strides = [1, 1]} : vector<4x96xf32> to vector<4x32xf32>
    %67 = arith.addf %65, %66 : vector<4x32xf32>
    %68 = arith.negf %67 : vector<4x32xf32>
    %69 = math.exp %68 : vector<4x32xf32>
    %cst_23 = arith.constant 1.000000e+00 : f32
    %70 = vector.broadcast %cst_23 : f32 to vector<4x32xf32>
    %71 = arith.addf %70, %69 : vector<4x32xf32>
    %72 = arith.divf %70, %71 : vector<4x32xf32>
    %73 = vector.extract_strided_slice %64 {offsets = [0, 32], sizes = [4, 32], strides = [1, 1]} : vector<4x96xf32> to vector<4x32xf32>
    %74 = vector.extract_strided_slice %61 {offsets = [0, 32], sizes = [4, 32], strides = [1, 1]} : vector<4x96xf32> to vector<4x32xf32>
    %75 = arith.addf %73, %74 : vector<4x32xf32>
    %76 = arith.negf %75 : vector<4x32xf32>
    %77 = math.exp %76 : vector<4x32xf32>
    %cst_24 = arith.constant 1.000000e+00 : f32
    %78 = vector.broadcast %cst_24 : f32 to vector<4x32xf32>
    %79 = arith.addf %78, %77 : vector<4x32xf32>
    %80 = arith.divf %78, %79 : vector<4x32xf32>
    %81 = vector.extract_strided_slice %64 {offsets = [0, 64], sizes = [4, 32], strides = [1, 1]} : vector<4x96xf32> to vector<4x32xf32>
    %82 = vector.extract_strided_slice %61 {offsets = [0, 64], sizes = [4, 32], strides = [1, 1]} : vector<4x96xf32> to vector<4x32xf32>
    %83 = arith.addf %82, %18 : vector<4x32xf32>
    %84 = arith.mulf %72, %83 : vector<4x32xf32>
    %85 = arith.addf %81, %84 : vector<4x32xf32>
    %86 = math.tanh %85 : vector<4x32xf32>
    %cst_25 = arith.constant 1.000000e+00 : f32
    %87 = vector.broadcast %cst_25 : f32 to vector<4x32xf32>
    %88 = arith.subf %87, %80 : vector<4x32xf32>
    %89 = arith.mulf %88, %86 : vector<4x32xf32>
    %90 = arith.mulf %80, %54 : vector<4x32xf32>
    %91 = arith.addf %89, %90 : vector<4x32xf32>
    %92 = vector.extract_strided_slice %91 {offsets = [0, 0], sizes = [2, 32], strides = [1, 1]} : vector<4x32xf32> to vector<2x32xf32>
    %93 = vector.extract_strided_slice %91 {offsets = [2, 0], sizes = [2, 32], strides = [1, 1]} : vector<4x32xf32> to vector<2x32xf32>
    %c0_26 = arith.constant 0 : index
    %c0_27 = arith.constant 0 : index
    %94 = vector.load %arg5[%c0_26, %c0_27] : memref<32x192xf32, #tpu.memory_space<vmem>>, vector<32x192xf32>
    %cst_28 = arith.constant dense<0.000000e+00> : vector<4x192xf32>
    %95 = tpu.matmul %91, %94, %cst_28 {dimension_numbers = #tpu.dot_dimension_numbers<[1], [0], [0], [1], [0, 0, 1, 1], [], []>} : vector<4x32xf32>, vector<32x192xf32>, vector<4x192xf32> -> vector<4x192xf32>
    %96 = vector.extract_strided_slice %95 {offsets = [0, 0], sizes = [2, 96], strides = [1, 1]} : vector<4x192xf32> to vector<2x96xf32>
    %97 = vector.extract_strided_slice %95 {offsets = [2, 96], sizes = [2, 96], strides = [1, 1]} : vector<4x192xf32> to vector<2x96xf32>
    %98 = tpu.concatenate %96, %97 in 0 : vector<2x96xf32>, vector<2x96xf32> -> vector<4x96xf32>
    %99 = vector.extract_strided_slice %17 {offsets = [4, 0], sizes = [2, 96], strides = [1, 1]} : vector<8x192xf32> to vector<2x96xf32>
    %100 = vector.extract_strided_slice %17 {offsets = [2, 96], sizes = [2, 96], strides = [1, 1]} : vector<8x192xf32> to vector<2x96xf32>
    %101 = tpu.concatenate %99, %100 in 0 : vector<2x96xf32>, vector<2x96xf32> -> vector<4x96xf32>
    %102 = vector.extract_strided_slice %101 {offsets = [0, 0], sizes = [4, 32], strides = [1, 1]} : vector<4x96xf32> to vector<4x32xf32>
    %103 = vector.extract_strided_slice %98 {offsets = [0, 0], sizes = [4, 32], strides = [1, 1]} : vector<4x96xf32> to vector<4x32xf32>
    %104 = arith.addf %102, %103 : vector<4x32xf32>
    %105 = arith.negf %104 : vector<4x32xf32>
    %106 = math.exp %105 : vector<4x32xf32>
    %cst_29 = arith.constant 1.000000e+00 : f32
    %107 = vector.broadcast %cst_29 : f32 to vector<4x32xf32>
    %108 = arith.addf %107, %106 : vector<4x32xf32>
    %109 = arith.divf %107, %108 : vector<4x32xf32>
    %110 = vector.extract_strided_slice %101 {offsets = [0, 32], sizes = [4, 32], strides = [1, 1]} : vector<4x96xf32> to vector<4x32xf32>
    %111 = vector.extract_strided_slice %98 {offsets = [0, 32], sizes = [4, 32], strides = [1, 1]} : vector<4x96xf32> to vector<4x32xf32>
    %112 = arith.addf %110, %111 : vector<4x32xf32>
    %113 = arith.negf %112 : vector<4x32xf32>
    %114 = math.exp %113 : vector<4x32xf32>
    %cst_30 = arith.constant 1.000000e+00 : f32
    %115 = vector.broadcast %cst_30 : f32 to vector<4x32xf32>
    %116 = arith.addf %115, %114 : vector<4x32xf32>
    %117 = arith.divf %115, %116 : vector<4x32xf32>
    %118 = vector.extract_strided_slice %101 {offsets = [0, 64], sizes = [4, 32], strides = [1, 1]} : vector<4x96xf32> to vector<4x32xf32>
    %119 = vector.extract_strided_slice %98 {offsets = [0, 64], sizes = [4, 32], strides = [1, 1]} : vector<4x96xf32> to vector<4x32xf32>
    %120 = arith.addf %119, %18 : vector<4x32xf32>
    %121 = arith.mulf %109, %120 : vector<4x32xf32>
    %122 = arith.addf %118, %121 : vector<4x32xf32>
    %123 = math.tanh %122 : vector<4x32xf32>
    %cst_31 = arith.constant 1.000000e+00 : f32
    %124 = vector.broadcast %cst_31 : f32 to vector<4x32xf32>
    %125 = arith.subf %124, %117 : vector<4x32xf32>
    %126 = arith.mulf %125, %123 : vector<4x32xf32>
    %127 = arith.mulf %117, %91 : vector<4x32xf32>
    %128 = arith.addf %126, %127 : vector<4x32xf32>
    %129 = vector.extract_strided_slice %128 {offsets = [0, 0], sizes = [2, 32], strides = [1, 1]} : vector<4x32xf32> to vector<2x32xf32>
    %130 = vector.extract_strided_slice %128 {offsets = [2, 0], sizes = [2, 32], strides = [1, 1]} : vector<4x32xf32> to vector<2x32xf32>
    %c0_32 = arith.constant 0 : index
    %c0_33 = arith.constant 0 : index
    %131 = vector.load %arg5[%c0_32, %c0_33] : memref<32x192xf32, #tpu.memory_space<vmem>>, vector<32x192xf32>
    %cst_34 = arith.constant dense<0.000000e+00> : vector<4x192xf32>
    %132 = tpu.matmul %128, %131, %cst_34 {dimension_numbers = #tpu.dot_dimension_numbers<[1], [0], [0], [1], [0, 0, 1, 1], [], []>} : vector<4x32xf32>, vector<32x192xf32>, vector<4x192xf32> -> vector<4x192xf32>
    %133 = vector.extract_strided_slice %132 {offsets = [0, 0], sizes = [2, 96], strides = [1, 1]} : vector<4x192xf32> to vector<2x96xf32>
    %134 = vector.extract_strided_slice %132 {offsets = [2, 96], sizes = [2, 96], strides = [1, 1]} : vector<4x192xf32> to vector<2x96xf32>
    %135 = tpu.concatenate %133, %134 in 0 : vector<2x96xf32>, vector<2x96xf32> -> vector<4x96xf32>
    %136 = vector.extract_strided_slice %17 {offsets = [6, 0], sizes = [2, 96], strides = [1, 1]} : vector<8x192xf32> to vector<2x96xf32>
    %137 = vector.extract_strided_slice %17 {offsets = [0, 96], sizes = [2, 96], strides = [1, 1]} : vector<8x192xf32> to vector<2x96xf32>
    %138 = tpu.concatenate %136, %137 in 0 : vector<2x96xf32>, vector<2x96xf32> -> vector<4x96xf32>
    %139 = vector.extract_strided_slice %138 {offsets = [0, 0], sizes = [4, 32], strides = [1, 1]} : vector<4x96xf32> to vector<4x32xf32>
    %140 = vector.extract_strided_slice %135 {offsets = [0, 0], sizes = [4, 32], strides = [1, 1]} : vector<4x96xf32> to vector<4x32xf32>
    %141 = arith.addf %139, %140 : vector<4x32xf32>
    %142 = arith.negf %141 : vector<4x32xf32>
    %143 = math.exp %142 : vector<4x32xf32>
    %cst_35 = arith.constant 1.000000e+00 : f32
    %144 = vector.broadcast %cst_35 : f32 to vector<4x32xf32>
    %145 = arith.addf %144, %143 : vector<4x32xf32>
    %146 = arith.divf %144, %145 : vector<4x32xf32>
    %147 = vector.extract_strided_slice %138 {offsets = [0, 32], sizes = [4, 32], strides = [1, 1]} : vector<4x96xf32> to vector<4x32xf32>
    %148 = vector.extract_strided_slice %135 {offsets = [0, 32], sizes = [4, 32], strides = [1, 1]} : vector<4x96xf32> to vector<4x32xf32>
    %149 = arith.addf %147, %148 : vector<4x32xf32>
    %150 = arith.negf %149 : vector<4x32xf32>
    %151 = math.exp %150 : vector<4x32xf32>
    %cst_36 = arith.constant 1.000000e+00 : f32
    %152 = vector.broadcast %cst_36 : f32 to vector<4x32xf32>
    %153 = arith.addf %152, %151 : vector<4x32xf32>
    %154 = arith.divf %152, %153 : vector<4x32xf32>
    %155 = vector.extract_strided_slice %138 {offsets = [0, 64], sizes = [4, 32], strides = [1, 1]} : vector<4x96xf32> to vector<4x32xf32>
    %156 = vector.extract_strided_slice %135 {offsets = [0, 64], sizes = [4, 32], strides = [1, 1]} : vector<4x96xf32> to vector<4x32xf32>
    %157 = arith.addf %156, %18 : vector<4x32xf32>
    %158 = arith.mulf %146, %157 : vector<4x32xf32>
    %159 = arith.addf %155, %158 : vector<4x32xf32>
    %160 = math.tanh %159 : vector<4x32xf32>
    %cst_37 = arith.constant 1.000000e+00 : f32
    %161 = vector.broadcast %cst_37 : f32 to vector<4x32xf32>
    %162 = arith.subf %161, %154 : vector<4x32xf32>
    %163 = arith.mulf %162, %160 : vector<4x32xf32>
    %164 = arith.mulf %154, %128 : vector<4x32xf32>
    %165 = arith.addf %163, %164 : vector<4x32xf32>
    %166 = vector.extract_strided_slice %165 {offsets = [0, 0], sizes = [2, 32], strides = [1, 1]} : vector<4x32xf32> to vector<2x32xf32>
    %167 = vector.extract_strided_slice %165 {offsets = [2, 0], sizes = [2, 32], strides = [1, 1]} : vector<4x32xf32> to vector<2x32xf32>
    %168 = tpu.concatenate %55, %92, %129, %166 in 0 : vector<2x32xf32>, vector<2x32xf32>, vector<2x32xf32>, vector<2x32xf32> -> vector<8x32xf32>
    %169 = tpu.concatenate %167, %130, %93, %56 in 0 : vector<2x32xf32>, vector<2x32xf32>, vector<2x32xf32>, vector<2x32xf32> -> vector<8x32xf32>
    %c0_38 = arith.constant 0 : index
    %c0_39 = arith.constant 0 : index
    %170 = vector.load %arg8[%c0_38, %c0_39] : memref<32x256xf32, #tpu.memory_space<vmem>>, vector<32x256xf32>
    %cst_40 = arith.constant dense<0.000000e+00> : vector<8x256xf32>
    %171 = tpu.matmul %168, %170, %cst_40 {dimension_numbers = #tpu.dot_dimension_numbers<[1], [0], [0], [1], [0, 0, 1, 1], [], []>} : vector<8x32xf32>, vector<32x256xf32>, vector<8x256xf32> -> vector<8x256xf32>
    %c0_41 = arith.constant 0 : index
    %c0_42 = arith.constant 0 : index
    %172 = vector.load %arg9[%c0_41, %c0_42] : memref<32x256xf32, #tpu.memory_space<vmem>>, vector<32x256xf32>
    %cst_43 = arith.constant dense<0.000000e+00> : vector<8x256xf32>
    %173 = tpu.matmul %169, %172, %cst_43 {dimension_numbers = #tpu.dot_dimension_numbers<[1], [0], [0], [1], [0, 0, 1, 1], [], []>} : vector<8x32xf32>, vector<32x256xf32>, vector<8x256xf32> -> vector<8x256xf32>
    %174 = arith.addf %171, %173 : vector<8x256xf32>
    %c0_44 = arith.constant 0 : index
    %c0_45 = arith.constant 0 : index
    %175 = vector.load %arg11[%c0_44, %c0_45] : memref<1x256xf32, #tpu.memory_space<vmem>>, vector<1x256xf32>
    %176 = vector.broadcast %175 : vector<1x256xf32> to vector<8x256xf32>
    %177 = arith.addf %174, %176 : vector<8x256xf32>
    %cst_46 = arith.constant 0.000000e+00 : f32
    %178 = vector.broadcast %cst_46 : f32 to vector<4x32xf32>
    %cst_47 = arith.constant 0.000000e+00 : f32
    %179 = vector.broadcast %cst_47 : f32 to vector<4x32xf32>
    %c0_48 = arith.constant 0 : index
    %c0_49 = arith.constant 0 : index
    %180 = vector.load %arg10[%c0_48, %c0_49] : memref<32x256xf32, #tpu.memory_space<vmem>>, vector<32x256xf32>
    %cst_50 = arith.constant dense<0.000000e+00> : vector<4x256xf32>
    %181 = tpu.matmul %178, %180, %cst_50 {dimension_numbers = #tpu.dot_dimension_numbers<[1], [0], [0], [1], [0, 0, 1, 1], [], []>} : vector<4x32xf32>, vector<32x256xf32>, vector<4x256xf32> -> vector<4x256xf32>
    %182 = vector.extract_strided_slice %181 {offsets = [0, 0], sizes = [2, 128], strides = [1, 1]} : vector<4x256xf32> to vector<2x128xf32>
    %183 = vector.extract_strided_slice %181 {offsets = [2, 128], sizes = [2, 128], strides = [1, 1]} : vector<4x256xf32> to vector<2x128xf32>
    %184 = tpu.concatenate %182, %183 in 0 : vector<2x128xf32>, vector<2x128xf32> -> vector<4x128xf32>
    %185 = vector.extract_strided_slice %177 {offsets = [0, 0], sizes = [2, 128], strides = [1, 1]} : vector<8x256xf32> to vector<2x128xf32>
    %186 = vector.extract_strided_slice %177 {offsets = [6, 128], sizes = [2, 128], strides = [1, 1]} : vector<8x256xf32> to vector<2x128xf32>
    %187 = tpu.concatenate %185, %186 in 0 : vector<2x128xf32>, vector<2x128xf32> -> vector<4x128xf32>
    %188 = arith.addf %187, %184 : vector<4x128xf32>
    %189 = vector.extract_strided_slice %188 {offsets = [0, 0], sizes = [4, 32], strides = [1, 1]} : vector<4x128xf32> to vector<4x32xf32>
    %190 = arith.negf %189 : vector<4x32xf32>
    %191 = math.exp %190 : vector<4x32xf32>
    %cst_51 = arith.constant 1.000000e+00 : f32
    %192 = vector.broadcast %cst_51 : f32 to vector<4x32xf32>
    %193 = arith.addf %192, %191 : vector<4x32xf32>
    %194 = arith.divf %192, %193 : vector<4x32xf32>
    %195 = vector.extract_strided_slice %188 {offsets = [0, 32], sizes = [4, 32], strides = [1, 1]} : vector<4x128xf32> to vector<4x32xf32>
    %196 = arith.negf %195 : vector<4x32xf32>
    %197 = math.exp %196 : vector<4x32xf32>
    %cst_52 = arith.constant 1.000000e+00 : f32
    %198 = vector.broadcast %cst_52 : f32 to vector<4x32xf32>
    %199 = arith.addf %198, %197 : vector<4x32xf32>
    %200 = arith.divf %198, %199 : vector<4x32xf32>
    %201 = vector.extract_strided_slice %188 {offsets = [0, 64], sizes = [4, 32], strides = [1, 1]} : vector<4x128xf32> to vector<4x32xf32>
    %202 = math.tanh %201 : vector<4x32xf32>
    %203 = vector.extract_strided_slice %188 {offsets = [0, 96], sizes = [4, 32], strides = [1, 1]} : vector<4x128xf32> to vector<4x32xf32>
    %204 = arith.negf %203 : vector<4x32xf32>
    %205 = math.exp %204 : vector<4x32xf32>
    %cst_53 = arith.constant 1.000000e+00 : f32
    %206 = vector.broadcast %cst_53 : f32 to vector<4x32xf32>
    %207 = arith.addf %206, %205 : vector<4x32xf32>
    %208 = arith.divf %206, %207 : vector<4x32xf32>
    %209 = arith.mulf %200, %179 : vector<4x32xf32>
    %210 = arith.mulf %194, %202 : vector<4x32xf32>
    %211 = arith.addf %209, %210 : vector<4x32xf32>
    %212 = math.tanh %211 : vector<4x32xf32>
    %213 = arith.mulf %208, %212 : vector<4x32xf32>
    %214 = vector.extract_strided_slice %213 {offsets = [2, 0], sizes = [2, 32], strides = [1, 1]} : vector<4x32xf32> to vector<2x32xf32>
    %c0_54 = arith.constant 0 : index
    %c0_55 = arith.constant 0 : index
    %215 = vector.load %arg10[%c0_54, %c0_55] : memref<32x256xf32, #tpu.memory_space<vmem>>, vector<32x256xf32>
    %cst_56 = arith.constant dense<0.000000e+00> : vector<4x256xf32>
    %216 = tpu.matmul %213, %215, %cst_56 {dimension_numbers = #tpu.dot_dimension_numbers<[1], [0], [0], [1], [0, 0, 1, 1], [], []>} : vector<4x32xf32>, vector<32x256xf32>, vector<4x256xf32> -> vector<4x256xf32>
    %217 = vector.extract_strided_slice %216 {offsets = [0, 0], sizes = [2, 128], strides = [1, 1]} : vector<4x256xf32> to vector<2x128xf32>
    %218 = vector.extract_strided_slice %216 {offsets = [2, 128], sizes = [2, 128], strides = [1, 1]} : vector<4x256xf32> to vector<2x128xf32>
    %219 = tpu.concatenate %217, %218 in 0 : vector<2x128xf32>, vector<2x128xf32> -> vector<4x128xf32>
    %220 = vector.extract_strided_slice %177 {offsets = [2, 0], sizes = [2, 128], strides = [1, 1]} : vector<8x256xf32> to vector<2x128xf32>
    %221 = vector.extract_strided_slice %177 {offsets = [4, 128], sizes = [2, 128], strides = [1, 1]} : vector<8x256xf32> to vector<2x128xf32>
    %222 = tpu.concatenate %220, %221 in 0 : vector<2x128xf32>, vector<2x128xf32> -> vector<4x128xf32>
    %223 = arith.addf %222, %219 : vector<4x128xf32>
    %224 = vector.extract_strided_slice %223 {offsets = [0, 0], sizes = [4, 32], strides = [1, 1]} : vector<4x128xf32> to vector<4x32xf32>
    %225 = arith.negf %224 : vector<4x32xf32>
    %226 = math.exp %225 : vector<4x32xf32>
    %cst_57 = arith.constant 1.000000e+00 : f32
    %227 = vector.broadcast %cst_57 : f32 to vector<4x32xf32>
    %228 = arith.addf %227, %226 : vector<4x32xf32>
    %229 = arith.divf %227, %228 : vector<4x32xf32>
    %230 = vector.extract_strided_slice %223 {offsets = [0, 32], sizes = [4, 32], strides = [1, 1]} : vector<4x128xf32> to vector<4x32xf32>
    %231 = arith.negf %230 : vector<4x32xf32>
    %232 = math.exp %231 : vector<4x32xf32>
    %cst_58 = arith.constant 1.000000e+00 : f32
    %233 = vector.broadcast %cst_58 : f32 to vector<4x32xf32>
    %234 = arith.addf %233, %232 : vector<4x32xf32>
    %235 = arith.divf %233, %234 : vector<4x32xf32>
    %236 = vector.extract_strided_slice %223 {offsets = [0, 64], sizes = [4, 32], strides = [1, 1]} : vector<4x128xf32> to vector<4x32xf32>
    %237 = math.tanh %236 : vector<4x32xf32>
    %238 = vector.extract_strided_slice %223 {offsets = [0, 96], sizes = [4, 32], strides = [1, 1]} : vector<4x128xf32> to vector<4x32xf32>
    %239 = arith.negf %238 : vector<4x32xf32>
    %240 = math.exp %239 : vector<4x32xf32>
    %cst_59 = arith.constant 1.000000e+00 : f32
    %241 = vector.broadcast %cst_59 : f32 to vector<4x32xf32>
    %242 = arith.addf %241, %240 : vector<4x32xf32>
    %243 = arith.divf %241, %242 : vector<4x32xf32>
    %244 = arith.mulf %235, %211 : vector<4x32xf32>
    %245 = arith.mulf %229, %237 : vector<4x32xf32>
    %246 = arith.addf %244, %245 : vector<4x32xf32>
    %247 = math.tanh %246 : vector<4x32xf32>
    %248 = arith.mulf %243, %247 : vector<4x32xf32>
    %c0_60 = arith.constant 0 : index
    %c0_61 = arith.constant 0 : index
    %249 = vector.load %arg10[%c0_60, %c0_61] : memref<32x256xf32, #tpu.memory_space<vmem>>, vector<32x256xf32>
    %cst_62 = arith.constant dense<0.000000e+00> : vector<4x256xf32>
    %250 = tpu.matmul %248, %249, %cst_62 {dimension_numbers = #tpu.dot_dimension_numbers<[1], [0], [0], [1], [0, 0, 1, 1], [], []>} : vector<4x32xf32>, vector<32x256xf32>, vector<4x256xf32> -> vector<4x256xf32>
    %251 = vector.extract_strided_slice %250 {offsets = [0, 0], sizes = [2, 128], strides = [1, 1]} : vector<4x256xf32> to vector<2x128xf32>
    %252 = vector.extract_strided_slice %250 {offsets = [2, 128], sizes = [2, 128], strides = [1, 1]} : vector<4x256xf32> to vector<2x128xf32>
    %253 = tpu.concatenate %251, %252 in 0 : vector<2x128xf32>, vector<2x128xf32> -> vector<4x128xf32>
    %254 = vector.extract_strided_slice %177 {offsets = [4, 0], sizes = [2, 128], strides = [1, 1]} : vector<8x256xf32> to vector<2x128xf32>
    %255 = vector.extract_strided_slice %177 {offsets = [2, 128], sizes = [2, 128], strides = [1, 1]} : vector<8x256xf32> to vector<2x128xf32>
    %256 = tpu.concatenate %254, %255 in 0 : vector<2x128xf32>, vector<2x128xf32> -> vector<4x128xf32>
    %257 = arith.addf %256, %253 : vector<4x128xf32>
    %258 = vector.extract_strided_slice %257 {offsets = [0, 0], sizes = [4, 32], strides = [1, 1]} : vector<4x128xf32> to vector<4x32xf32>
    %259 = arith.negf %258 : vector<4x32xf32>
    %260 = math.exp %259 : vector<4x32xf32>
    %cst_63 = arith.constant 1.000000e+00 : f32
    %261 = vector.broadcast %cst_63 : f32 to vector<4x32xf32>
    %262 = arith.addf %261, %260 : vector<4x32xf32>
    %263 = arith.divf %261, %262 : vector<4x32xf32>
    %264 = vector.extract_strided_slice %257 {offsets = [0, 32], sizes = [4, 32], strides = [1, 1]} : vector<4x128xf32> to vector<4x32xf32>
    %265 = arith.negf %264 : vector<4x32xf32>
    %266 = math.exp %265 : vector<4x32xf32>
    %cst_64 = arith.constant 1.000000e+00 : f32
    %267 = vector.broadcast %cst_64 : f32 to vector<4x32xf32>
    %268 = arith.addf %267, %266 : vector<4x32xf32>
    %269 = arith.divf %267, %268 : vector<4x32xf32>
    %270 = vector.extract_strided_slice %257 {offsets = [0, 64], sizes = [4, 32], strides = [1, 1]} : vector<4x128xf32> to vector<4x32xf32>
    %271 = math.tanh %270 : vector<4x32xf32>
    %272 = vector.extract_strided_slice %257 {offsets = [0, 96], sizes = [4, 32], strides = [1, 1]} : vector<4x128xf32> to vector<4x32xf32>
    %273 = arith.negf %272 : vector<4x32xf32>
    %274 = math.exp %273 : vector<4x32xf32>
    %cst_65 = arith.constant 1.000000e+00 : f32
    %275 = vector.broadcast %cst_65 : f32 to vector<4x32xf32>
    %276 = arith.addf %275, %274 : vector<4x32xf32>
    %277 = arith.divf %275, %276 : vector<4x32xf32>
    %278 = arith.mulf %269, %246 : vector<4x32xf32>
    %279 = arith.mulf %263, %271 : vector<4x32xf32>
    %280 = arith.addf %278, %279 : vector<4x32xf32>
    %281 = math.tanh %280 : vector<4x32xf32>
    %282 = arith.mulf %277, %281 : vector<4x32xf32>
    %c0_66 = arith.constant 0 : index
    %c0_67 = arith.constant 0 : index
    %283 = vector.load %arg10[%c0_66, %c0_67] : memref<32x256xf32, #tpu.memory_space<vmem>>, vector<32x256xf32>
    %cst_68 = arith.constant dense<0.000000e+00> : vector<4x256xf32>
    %284 = tpu.matmul %282, %283, %cst_68 {dimension_numbers = #tpu.dot_dimension_numbers<[1], [0], [0], [1], [0, 0, 1, 1], [], []>} : vector<4x32xf32>, vector<32x256xf32>, vector<4x256xf32> -> vector<4x256xf32>
    %285 = vector.extract_strided_slice %284 {offsets = [0, 0], sizes = [2, 128], strides = [1, 1]} : vector<4x256xf32> to vector<2x128xf32>
    %286 = vector.extract_strided_slice %284 {offsets = [2, 128], sizes = [2, 128], strides = [1, 1]} : vector<4x256xf32> to vector<2x128xf32>
    %287 = tpu.concatenate %285, %286 in 0 : vector<2x128xf32>, vector<2x128xf32> -> vector<4x128xf32>
    %288 = vector.extract_strided_slice %177 {offsets = [6, 0], sizes = [2, 128], strides = [1, 1]} : vector<8x256xf32> to vector<2x128xf32>
    %289 = vector.extract_strided_slice %177 {offsets = [0, 128], sizes = [2, 128], strides = [1, 1]} : vector<8x256xf32> to vector<2x128xf32>
    %290 = tpu.concatenate %288, %289 in 0 : vector<2x128xf32>, vector<2x128xf32> -> vector<4x128xf32>
    %291 = arith.addf %290, %287 : vector<4x128xf32>
    %292 = vector.extract_strided_slice %291 {offsets = [0, 0], sizes = [4, 32], strides = [1, 1]} : vector<4x128xf32> to vector<4x32xf32>
    %293 = arith.negf %292 : vector<4x32xf32>
    %294 = math.exp %293 : vector<4x32xf32>
    %cst_69 = arith.constant 1.000000e+00 : f32
    %295 = vector.broadcast %cst_69 : f32 to vector<4x32xf32>
    %296 = arith.addf %295, %294 : vector<4x32xf32>
    %297 = arith.divf %295, %296 : vector<4x32xf32>
    %298 = vector.extract_strided_slice %291 {offsets = [0, 32], sizes = [4, 32], strides = [1, 1]} : vector<4x128xf32> to vector<4x32xf32>
    %299 = arith.negf %298 : vector<4x32xf32>
    %300 = math.exp %299 : vector<4x32xf32>
    %cst_70 = arith.constant 1.000000e+00 : f32
    %301 = vector.broadcast %cst_70 : f32 to vector<4x32xf32>
    %302 = arith.addf %301, %300 : vector<4x32xf32>
    %303 = arith.divf %301, %302 : vector<4x32xf32>
    %304 = vector.extract_strided_slice %291 {offsets = [0, 64], sizes = [4, 32], strides = [1, 1]} : vector<4x128xf32> to vector<4x32xf32>
    %305 = math.tanh %304 : vector<4x32xf32>
    %306 = vector.extract_strided_slice %291 {offsets = [0, 96], sizes = [4, 32], strides = [1, 1]} : vector<4x128xf32> to vector<4x32xf32>
    %307 = arith.negf %306 : vector<4x32xf32>
    %308 = math.exp %307 : vector<4x32xf32>
    %cst_71 = arith.constant 1.000000e+00 : f32
    %309 = vector.broadcast %cst_71 : f32 to vector<4x32xf32>
    %310 = arith.addf %309, %308 : vector<4x32xf32>
    %311 = arith.divf %309, %310 : vector<4x32xf32>
    %312 = arith.mulf %303, %280 : vector<4x32xf32>
    %313 = arith.mulf %297, %305 : vector<4x32xf32>
    %314 = arith.addf %312, %313 : vector<4x32xf32>
    %315 = math.tanh %314 : vector<4x32xf32>
    %316 = arith.mulf %311, %315 : vector<4x32xf32>
    %317 = vector.extract_strided_slice %316 {offsets = [0, 0], sizes = [2, 32], strides = [1, 1]} : vector<4x32xf32> to vector<2x32xf32>
    %318 = tpu.concatenate %317, %214 in 1 : vector<2x32xf32>, vector<2x32xf32> -> vector<2x64xf32>
    %c0_72 = arith.constant 0 : index
    %c0_73 = arith.constant 0 : index
    %319 = vector.load %arg12[%c0_72, %c0_73] : memref<64x64xf32, #tpu.memory_space<vmem>>, vector<64x64xf32>
    %cst_74 = arith.constant dense<0.000000e+00> : vector<2x64xf32>
    %320 = tpu.matmul %318, %319, %cst_74 {dimension_numbers = #tpu.dot_dimension_numbers<[1], [0], [0], [1], [0, 0, 1, 1], [], []>} : vector<2x64xf32>, vector<64x64xf32>, vector<2x64xf32> -> vector<2x64xf32>
    %c0_75 = arith.constant 0 : index
    %c0_76 = arith.constant 0 : index
    %321 = vector.load %arg13[%c0_75, %c0_76] : memref<1x64xf32, #tpu.memory_space<vmem>>, vector<1x64xf32>
    %322 = vector.broadcast %321 : vector<1x64xf32> to vector<2x64xf32>
    %323 = arith.addf %320, %322 : vector<2x64xf32>
    %cst_77 = arith.constant 0.000000e+00 : f32
    %324 = vector.broadcast %cst_77 : f32 to vector<2x64xf32>
    %325 = arith.maximumf %323, %324 : vector<2x64xf32>
    %c0_78 = arith.constant 0 : index
    %c0_79 = arith.constant 0 : index
    %326 = vector.load %arg14[%c0_78, %c0_79] : memref<64x64xf32, #tpu.memory_space<vmem>>, vector<64x64xf32>
    %cst_80 = arith.constant dense<0.000000e+00> : vector<2x64xf32>
    %327 = tpu.matmul %325, %326, %cst_80 {dimension_numbers = #tpu.dot_dimension_numbers<[1], [0], [0], [1], [0, 0, 1, 1], [], []>} : vector<2x64xf32>, vector<64x64xf32>, vector<2x64xf32> -> vector<2x64xf32>
    %c0_81 = arith.constant 0 : index
    %c0_82 = arith.constant 0 : index
    %328 = vector.load %arg15[%c0_81, %c0_82] : memref<1x64xf32, #tpu.memory_space<vmem>>, vector<1x64xf32>
    %329 = vector.broadcast %328 : vector<1x64xf32> to vector<2x64xf32>
    %330 = arith.addf %327, %329 : vector<2x64xf32>
    %331 = arith.addf %330, %318 : vector<2x64xf32>
    %c0_83 = arith.constant 0 : index
    %c0_84 = arith.constant 0 : index
    %332 = vector.load %arg16[%c0_83, %c0_84] : memref<64x2xf32, #tpu.memory_space<vmem>>, vector<64x2xf32>
    %cst_85 = arith.constant dense<0.000000e+00> : vector<2x2xf32>
    %333 = tpu.matmul %331, %332, %cst_85 {dimension_numbers = #tpu.dot_dimension_numbers<[1], [0], [0], [1], [0, 0, 1, 1], [], []>} : vector<2x64xf32>, vector<64x2xf32>, vector<2x2xf32> -> vector<2x2xf32>
    %c0_86 = arith.constant 0 : index
    %c0_87 = arith.constant 0 : index
    %334 = vector.load %arg17[%c0_86, %c0_87] : memref<1x2xf32, #tpu.memory_space<vmem>>, vector<1x2xf32>
    %335 = vector.broadcast %334 : vector<1x2xf32> to vector<2x2xf32>
    %336 = arith.addf %333, %335 : vector<2x2xf32>
    %cst_88 = arith.constant dense<0xFF800000> : vector<2xf32>
    %337 = vector.multi_reduction <maximumf>, %336, %cst_88 [1] : vector<2x2xf32> to vector<2xf32>
    %338 = vector.shape_cast %337 : vector<2xf32> to vector<2x1xf32>
    %339 = vector.broadcast %338 : vector<2x1xf32> to vector<2x2xf32>
    %340 = arith.subf %336, %339 : vector<2x2xf32>
    %341 = math.exp %340 : vector<2x2xf32>
    %cst_89 = arith.constant dense<0.000000e+00> : vector<2xf32>
    %342 = vector.multi_reduction <add>, %341, %cst_89 [1] : vector<2x2xf32> to vector<2xf32>
    %343 = vector.shape_cast %342 : vector<2xf32> to vector<2x1xf32>
    %344 = vector.broadcast %343 : vector<2x1xf32> to vector<2x2xf32>
    %345 = arith.divf %341, %344 : vector<2x2xf32>
    %c0_90 = arith.constant 0 : index
    %c0_91 = arith.constant 0 : index
    %346 = vector.load %arg18[%c0_90, %c0_91] : memref<2x2xf32, #tpu.memory_space<vmem>>, vector<2x2xf32>
    tpu.vector_store %arg18[%c0_90, %c0_91], %345 {strides = array<i32>} : memref<2x2xf32, #tpu.memory_space<vmem>>, vector<2x2xf32>,
    return
  }
  func.func @transform_0(%arg0: i32) -> (i32, i32) {
    %c0_i32 = arith.constant 0 : i32
    %c0_i32_0 = arith.constant 0 : i32
    %c0_i32_1 = arith.constant 0 : i32
    return %c0_i32, %c0_i32_0 : i32, i32
  }
  func.func @transform_1(%arg0: i32) -> (i32, i32) {
    %c0_i32 = arith.constant 0 : i32
    %c0_i32_0 = arith.constant 0 : i32
    %c0_i32_1 = arith.constant 0 : i32
    return %c0_i32, %c0_i32_0 : i32, i32
  }
  func.func @transform_2(%arg0: i32) -> (i32, i32) {
    %c0_i32 = arith.constant 0 : i32
    %c0_i32_0 = arith.constant 0 : i32
    %c0_i32_1 = arith.constant 0 : i32
    return %c0_i32, %c0_i32_0 : i32, i32
  }
  func.func @transform_3(%arg0: i32) -> (i32, i32) {
    %c0_i32 = arith.constant 0 : i32
    %c0_i32_0 = arith.constant 0 : i32
    %c0_i32_1 = arith.constant 0 : i32
    return %c0_i32, %c0_i32_0 : i32, i32
  }
  func.func @transform_4(%arg0: i32) -> (i32, i32) {
    %c0_i32 = arith.constant 0 : i32
    %c0_i32_0 = arith.constant 0 : i32
    %c0_i32_1 = arith.constant 0 : i32
    return %c0_i32, %c0_i32_0 : i32, i32
  }
  func.func @transform_5(%arg0: i32) -> (i32, i32) {
    %c0_i32 = arith.constant 0 : i32
    %c0_i32_0 = arith.constant 0 : i32
    %c0_i32_1 = arith.constant 0 : i32
    return %c0_i32, %c0_i32_0 : i32, i32
  }
  func.func @transform_6(%arg0: i32) -> (i32, i32) {
    %c0_i32 = arith.constant 0 : i32
    %c0_i32_0 = arith.constant 0 : i32
    %c0_i32_1 = arith.constant 0 : i32
    return %c0_i32, %c0_i32_0 : i32, i32
  }
  func.func @transform_7(%arg0: i32) -> (i32, i32) {
    %c0_i32 = arith.constant 0 : i32
    %c0_i32_0 = arith.constant 0 : i32
    %c0_i32_1 = arith.constant 0 : i32
    return %c0_i32, %c0_i32_0 : i32, i32
  }
  func.func @transform_8(%arg0: i32) -> (i32, i32) {
    %c0_i32 = arith.constant 0 : i32
    %c0_i32_0 = arith.constant 0 : i32
    %c0_i32_1 = arith.constant 0 : i32
    return %c0_i32, %c0_i32_0 : i32, i32
  }
  func.func @transform_9(%arg0: i32) -> (i32, i32) {
    %c0_i32 = arith.constant 0 : i32
    %c0_i32_0 = arith.constant 0 : i32
    %c0_i32_1 = arith.constant 0 : i32
    return %c0_i32, %c0_i32_0 : i32, i32
  }
  func.func @transform_10(%arg0: i32) -> (i32, i32) {
    %c0_i32 = arith.constant 0 : i32
    %c0_i32_0 = arith.constant 0 : i32
    %c0_i32_1 = arith.constant 0 : i32
    return %c0_i32, %c0_i32_0 : i32, i32
  }
  func.func @transform_11(%arg0: i32) -> (i32, i32) {
    %c0_i32 = arith.constant 0 : i32
    %c0_i32_0 = arith.constant 0 : i32
    %c0_i32_1 = arith.constant 0 : i32
    return %c0_i32, %c0_i32_0 : i32, i32
  }
  func.func @transform_12(%arg0: i32) -> (i32, i32) {
    %c0_i32 = arith.constant 0 : i32
    %c0_i32_0 = arith.constant 0 : i32
    %c0_i32_1 = arith.constant 0 : i32
    return %c0_i32, %c0_i32_0 : i32, i32
  }
  func.func @transform_13(%arg0: i32) -> (i32, i32) {
    %c0_i32 = arith.constant 0 : i32
    %c0_i32_0 = arith.constant 0 : i32
    %c0_i32_1 = arith.constant 0 : i32
    return %c0_i32, %c0_i32_0 : i32, i32
  }
  func.func @transform_14(%arg0: i32) -> (i32, i32) {
    %c0_i32 = arith.constant 0 : i32
    %c0_i32_0 = arith.constant 0 : i32
    %c0_i32_1 = arith.constant 0 : i32
    return %c0_i32, %c0_i32_0 : i32, i32
  }
  func.func @transform_15(%arg0: i32) -> (i32, i32) {
    %c0_i32 = arith.constant 0 : i32
    %c0_i32_0 = arith.constant 0 : i32
    %c0_i32_1 = arith.constant 0 : i32
    return %c0_i32, %c0_i32_0 : i32, i32
  }
  func.func @transform_16(%arg0: i32) -> (i32, i32) {
    %c0_i32 = arith.constant 0 : i32
    %c0_i32_0 = arith.constant 0 : i32
    %c0_i32_1 = arith.constant 0 : i32
    return %c0_i32, %c0_i32_0 : i32, i32
  }
  func.func @transform_17(%arg0: i32) -> (i32, i32) {
    %c0_i32 = arith.constant 0 : i32
    %c0_i32_0 = arith.constant 0 : i32
    %c0_i32_1 = arith.constant 0 : i32
    return %c0_i32, %c0_i32_0 : i32, i32
  }
}

</mosaic_0001>

<bundles_post_ra>
// kernel: tpu_custom_call.1
= control target key start
LH: loop header
LB: loop body
LE: loop exit
PB: predicated region body
PF: predicated region fallthrough
CT: control target
= control target key end

     0   :  { %s2922_s0 = inlined_call_operand.vmem [shape: f32[16,408], index: 0, kind: input, shape index: {}]   ;;  %s2923_s1 = inlined_call_operand.vmem [shape: f32[408,64], index: 1, kind: input, shape index: {}]   ;;  %s2924_s2 = inlined_call_operand.vmem [shape: f32[1,64], index: 2, kind: input, shape index: {}]   ;;  %s2925_s3 = inlined_call_operand.vmem [shape: f32[64,192], index: 3, kind: input, shape index: {}]   ;;  %s2926_s4 = inlined_call_operand.vmem [shape: f32[32,192], index: 4, kind: input, shape index: {}]   ;;  %s2927_s5 = inlined_call_operand.vmem [shape: f32[1,192], index: 5, kind: input, shape index: {}]   ;;  %s2928_s6 = inlined_call_operand.vmem [shape: f32[4,32], index: 6, kind: input, shape index: {}]   ;;  %s2929_s7 = inlined_call_operand.vmem [shape: f32[32,256], index: 7, kind: input, shape index: {}]   ;;  %s2930_s8 = inlined_call_operand.vmem [shape: f32[32,256], index: 8, kind: input, shape index: {}]   ;;  %s2931_s9 = inlined_call_operand.vmem [shape: f32[32,256], index: 9, kind: input, shape index: {}]   ;;  %s2932_s10 = inlined_call_operand.vmem [shape: f32[1,256], index: 10, kind: input, shape index: {}]   ;;  %s2933_s11 = inlined_call_operand.vmem [shape: f32[64,64], index: 11, kind: input, shape index: {}]   ;;  %s2934_s12 = inlined_call_operand.vmem [shape: f32[1,64], index: 12, kind: input, shape index: {}]   ;;  %s2935_s13 = inlined_call_operand.vmem [shape: f32[64,64], index: 13, kind: input, shape index: {}]   ;;  %s2936_s14 = inlined_call_operand.vmem [shape: f32[1,64], index: 14, kind: input, shape index: {}]   ;;  %s2937_s15 = inlined_call_operand.vmem [shape: f32[64,2], index: 15, kind: input, shape index: {}]   ;;  %s2938_s16 = inlined_call_operand.vmem [shape: f32[1,2], index: 16, kind: input, shape index: {}]   ;;  %s2939_s17 = inlined_call_operand.hbm [shape: f32[2,2], index: 17, kind: output, shape index: {}]  }
   0x1   :  { %2942 = sst [smem:[#allocation5_spill]] %s2922_s0 }
   0x2   :  { %2943 = sst [smem:[#allocation6_spill]] %s2923_s1 }
   0x3   :  { %s2944_s26 = sld [smem:[#allocation6_spill]]  ;;  %v2098_v3 = vmov 0.0  }
   0x4   :  { %205 = vmatprep.subr.mxu1 %v2098_v3 }
   0x9   :  { %v96_v0 = vld [vmem:[%s2944_s26 + $0xf8] sm:$0xff]  ;;  %v95_v4 = vld [vmem:[%s2944_s26 + $0xf0] sm:$0xff]  ;;  %v94_v7 = vld [vmem:[%s2944_s26 + $0xe8] sm:$0xff] }
   0xa   :  { %v80_v1 = vld [vmem:[%s2944_s26 + $0x78] sm:$0xff]  ;;  %1887 = vmatprep.subr.mxu0 %v96_v0  ;;  %v79_v5 = vld [vmem:[%s2944_s26 + $0x70] sm:$0xff]  ;;  %v78_v8 = vld [vmem:[%s2944_s26 + $0x68] sm:$0xff] }
   0xb   :  { %v112_v2 = vld [vmem:[%s2944_s26 + $0x178] sm:$0xff]  ;;  %v111_v6 = vld [vmem:[%s2944_s26 + $0x170] sm:$0xff]  ;;  %1888 = vmatpush3.msra.mxu0 %v80_v1  ;;  %v110_v9 = vld [vmem:[%s2944_s26 + $0x168] sm:$0xff] }
   0xc   :  { %206 = vmatpush1.msra.mxu1 %v112_v2  ;;  %1889 = vmatprep.subr.mxu0 %v95_v4  ;;  %v93_v10 = vld [vmem:[%s2944_s26 + $0xe0] sm:$0xff]  ;;  %v92_v13 = vld [vmem:[%s2944_s26 + $0xd8] sm:$0xff]  ;;  %v91_v16 = vld [vmem:[%s2944_s26 + $0xd0] sm:$0xff] }
   0xd   :  { %207 = vmatprep.subr.mxu1 %v2098_v3  ;;  %1890 = vmatpush3.msra.mxu0 %v79_v5  ;;  %v77_v11 = vld [vmem:[%s2944_s26 + $0x60] sm:$0xff]  ;;  %v76_v14 = vld [vmem:[%s2944_s26 + $0x58] sm:$0xff]  ;;  %v75_v17 = vld [vmem:[%s2944_s26 + $0x50] sm:$0xff] }
   0xe   :  { %208 = vmatpush1.msra.mxu1 %v111_v6  ;;  %1891 = vmatprep.subr.mxu0 %v94_v7  ;;  %v109_v12 = vld [vmem:[%s2944_s26 + $0x160] sm:$0xff]  ;;  %v108_v15 = vld [vmem:[%s2944_s26 + $0x158] sm:$0xff]  ;;  %v107_v18 = vld [vmem:[%s2944_s26 + $0x150] sm:$0xff] }
   0xf   :  { %209 = vmatprep.subr.mxu1 %v2098_v3  ;;  %1892 = vmatpush3.msra.mxu0 %v78_v8  ;;  %v90_v19 = vld [vmem:[%s2944_s26 + $0xc8] sm:$0xff]  ;;  %v89_v22 = vld [vmem:[%s2944_s26 + $0xc0] sm:$0xff]  ;;  %v88_v25 = vld [vmem:[%s2944_s26 + $0xb8] sm:$0xff] }
  0x10   :  { %210 = vmatpush1.msra.mxu1 %v110_v9  ;;  %1893 = vmatprep.subr.mxu0 %v93_v10  ;;  %v74_v20 = vld [vmem:[%s2944_s26 + $0x48] sm:$0xff]  ;;  %v73_v23 = vld [vmem:[%s2944_s26 + $0x40] sm:$0xff]  ;;  %v72_v26 = vld [vmem:[%s2944_s26 + $0x38] sm:$0xff] }
  0x11   :  { %211 = vmatprep.subr.mxu1 %v2098_v3  ;;  %1894 = vmatpush3.msra.mxu0 %v77_v11  ;;  %v106_v21 = vld [vmem:[%s2944_s26 + $0x148] sm:$0xff]  ;;  %v105_v24 = vld [vmem:[%s2944_s26 + $0x140] sm:$0xff]  ;;  %v104_v27 = vld [vmem:[%s2944_s26 + $0x138] sm:$0xff] }
  0x12   :  { %212 = vmatpush1.msra.mxu1 %v109_v12  ;;  %1895 = vmatprep.subr.mxu0 %v92_v13  ;;  %v87_v28 = vld [vmem:[%s2944_s26 + $0xb0] sm:$0xff]  ;;  %v86_v31 = vld [vmem:[%s2944_s26 + $0xa8] sm:$0xff]  ;;  %v85_v34 = vld [vmem:[%s2944_s26 + $0xa0] sm:$0xff] }
  0x13   :  { %213 = vmatprep.subr.mxu1 %v2098_v3  ;;  %1896 = vmatpush3.msra.mxu0 %v76_v14  ;;  %v71_v29 = vld [vmem:[%s2944_s26 + $0x30] sm:$0xff]  ;;  %v70_v32 = vld [vmem:[%s2944_s26 + $0x28] sm:$0xff]  ;;  %v69_v35 = vld [vmem:[%s2944_s26 + $0x20] sm:$0xff] }
  0x14   :  { %214 = vmatpush1.msra.mxu1 %v108_v15  ;;  %1897 = vmatprep.subr.mxu0 %v91_v16  ;;  %v103_v30 = vld [vmem:[%s2944_s26 + $0x130] sm:$0xff]  ;;  %v102_v33 = vld [vmem:[%s2944_s26 + $0x128] sm:$0xff]  ;;  %v101_v36 = vld [vmem:[%s2944_s26 + $0x120] sm:$0xff] }
  0x15   :  { %215 = vmatprep.subr.mxu1 %v2098_v3  ;;  %1898 = vmatpush3.msra.mxu0 %v75_v17  ;;  %v84_v37 = vld [vmem:[%s2944_s26 + $0x98] sm:$0xff] }
  0x16   :  { %216 = vmatpush1.msra.mxu1 %v107_v18  ;;  %1899 = vmatprep.subr.mxu0 %v90_v19 }
  0x17   :  { %217 = vmatprep.subr.mxu1 %v2098_v3  ;;  %1900 = vmatpush3.msra.mxu0 %v74_v20 }
  0x18   :  { %218 = vmatpush1.msra.mxu1 %v106_v21  ;;  %1901 = vmatprep.subr.mxu0 %v89_v22 }
  0x19   :  { %219 = vmatprep.subr.mxu1 %v2098_v3  ;;  %1902 = vmatpush3.msra.mxu0 %v73_v23 }
  0x1a   :  { %220 = vmatpush1.msra.mxu1 %v105_v24  ;;  %1903 = vmatprep.subr.mxu0 %v88_v25 }
  0x1b   :  { %221 = vmatprep.subr.mxu1 %v2098_v3  ;;  %1904 = vmatpush3.msra.mxu0 %v72_v26 }
  0x1c   :  { %222 = vmatpush1.msra.mxu1 %v104_v27  ;;  %1905 = vmatprep.subr.mxu0 %v87_v28 }
  0x1d   :  { %223 = vmatprep.subr.mxu1 %v2098_v3  ;;  %1906 = vmatpush3.msra.mxu0 %v71_v29 }
  0x1e   :  { %224 = vmatpush1.msra.mxu1 %v103_v30  ;;  %1907 = vmatprep.subr.mxu0 %v86_v31 }
  0x1f   :  { %225 = vmatprep.subr.mxu1 %v2098_v3  ;;  %1908 = vmatpush3.msra.mxu0 %v70_v32 }
  0x20   :  { %226 = vmatpush1.msra.mxu1 %v102_v33 }
  0x21   :  { %22 = vsyncpa [#allocation3], 0  ;;  %1909 = vmatprep.subr.mxu0 %v85_v34  ;;  %227 = vmatprep.subr.mxu1 %v2098_v3  ;;  %v68_v38 = vld [vmem:[%s2944_s26 + $0x18] sm:$0xff]  ;;  %v83_v40 = vld [vmem:[%s2944_s26 + $0x90] sm:$0xff]  ;;  %s2945_s22 = sld [smem:[#allocation5_spill]]  ;;  %vm123_vm0 = vcmask 195584  }
  0x22   :  { %v100_v39 = vld [vmem:[%s2944_s26 + $0x118] sm:$0xff]  ;;  %1910 = vmatpush3.msra.mxu0 %v69_v35  ;;  %228 = vmatpush1.msra.mxu1 %v101_v36  ;;  %v67_v41 = vld [vmem:[%s2944_s26 + $0x10] sm:$0xff]  ;;  %v82_v43 = vld [vmem:[%s2944_s26 + $0x88] sm:$0xff]  ;;  %v322_v35 = vlaneseq  ;;  %vm353_vm1 = vcmask 523264   ;;  %vm436_vm2 = vcmask 261120   ;;  %vm519_vm3 = vcmask 1041408  }
  0x23   :  { %1911 = vmatprep.subr.mxu0 %v84_v37  ;;  %229 = vmatprep.subr.mxu1 %v2098_v3  ;;  %v99_v42 = vld [vmem:[%s2944_s26 + $0x110] sm:$0xff]  ;;  %v66_v44 = vld [vmem:[%s2944_s26 + $0x8] sm:$0xff]  ;;  %v81_v46 = vld [vmem:[%s2944_s26 + $0x80] sm:$0xff]  ;;  %vm935_vm4 = vcmask 1043456   ;;  %vm937_vm5 = vcmask 1045504   ;;  %vm2103_vm6 = vmmov 0  }
  0x24   :  { %1912 = vmatpush3.msra.mxu0 %v68_v38  ;;  %230 = vmatpush1.msra.mxu1 %v100_v39  ;;  %v98_v45 = vld [vmem:[%s2944_s26 + $0x108] sm:$0xff]  ;;  %v65_v47 = vld [vmem:[%s2944_s26] sm:$0xff]  ;;  %v115_v52 = vld [vmem:[%s2944_s26 + $0x190] sm:$0xff]  ;;  %v2100_v38 = vmov 1983009808   ;;  %vm1830_vm7 = vcmask 9216  }
  0x25   :  { %1913 = vmatprep.subr.mxu0 %v83_v40  ;;  %231 = vmatprep.subr.mxu1 %v2098_v3  ;;  %v97_v49 = vld [vmem:[%s2944_s26 + $0x100] sm:$0xff]  ;;  %v114_v54 = vld [vmem:[%s2944_s26 + $0x188] sm:$0xff]  ;;  %v2388_v58 = vld [vmem:[%s2926_s4 + $0x38] sm:$0xff]  ;;  %v339_v39 = vunpack.c.l.s4 %v2100_v38 }
  0x26   :  { %1914 = vmatpush3.msra.mxu0 %v67_v41  ;;  %232 = vmatpush1.msra.mxu1 %v99_v42  ;;  %v113_v56 = vld [vmem:[%s2944_s26 + $0x180] sm:$0xff]  ;;  %v2397_v60 = vld [vmem:[%s2926_s4 + $0x30] sm:$0xff]  ;;  %v2403_v61 = vld [vmem:[%s2926_s4 + $0x28] sm:$0xff] }
  0x27   :  { %1915 = vmatprep.subr.mxu0 %v82_v43  ;;  %233 = vmatprep.subr.mxu1 %v2098_v3  ;;  %v58_v48 = vld [vmem:[%s2945_s22 + $0x8] sm:$0xff]  ;;  %v57_v50 = vld [vmem:[%s2945_s22] sm:$0xff]  ;;  %v60_v53 = vld [vmem:[%s2945_s22 + $0x18] sm:$0xff] }
  0x28   :  { %1916 = vmatpush3.msra.mxu0 %v66_v44  ;;  %234 = vmatpush1.msra.mxu1 %v98_v45  ;;  %v62_v51 = vld [vmem:[%s2945_s22 + $0x28] sm:$0xff]  ;;  %v61_v55 = vld [vmem:[%s2945_s22 + $0x20] sm:$0xff]  ;;  %v59_v57 = vld [vmem:[%s2945_s22 + $0x10] sm:$0xff]  ;;  %v2509_v45 = vshrl.u32 %v322_v35, 7 }
  0x29   :  { %1917 = vmatprep.subr.mxu0 %v81_v46  ;;  %235 = vmatprep.subr.mxu1 %v2098_v3  ;;  %v64_v59 = vld [vmem:[%s2945_s22 + $0x38] sm:$0xff]  ;;  %v2409_v62 = vld [vmem:[%s2926_s4 + $0x20] sm:$0xff]  ;;  %v63_v63 = vld [vmem:[%s2945_s22 + $0x30] sm:$0xff] }
  0x2a   :  { %1918 = vmatpush3.msra.mxu0 %v65_v47  ;;  %194 = vmatprep.mubr.f32.mxu0 %v58_v48  ;;  %v2419_v0 = vld [vmem:[%s2926_s4 + $0x18] sm:$0xff]  ;;  %v2425_v1 = vld [vmem:[%s2926_s4 + $0x10] sm:$0xff]  ;;  %v2431_v2 = vld [vmem:[%s2926_s4 + $0x8] sm:$0xff]  ;;  %v340_v48 = vunpack.c.0.s8 %v339_v39 }
  0x2b   :  { %236 = vmatpush1.msra.mxu1 %v97_v49  ;;  %195 = vmatmul.mubr.f32.vlgmr.msra.gmra.mxu0 %v57_v50  ;;  %v2437_v4 = vld [vmem:[%s2926_s4] sm:$0xff]  ;;  %v319_v5 = vld [vmem:[%s2925_s3 + $0x78] sm:$0xff]  ;;  %v318_v6 = vld [vmem:[%s2925_s3 + $0x70] sm:$0xff]  ;;  %s2099_s4 = smov 64  }
  0x2c   :  { %263 = vmatprep.subr.mxu1 %v2098_v3  ;;  %199 = vmatprep.mubr.f32.mxu0 %v62_v51  ;;  %v317_v7 = vld [vmem:[%s2925_s3 + $0x68] sm:$0xff]  ;;  %v316_v8 = vld [vmem:[%s2925_s3 + $0x60] sm:$0xff]  ;;  %v315_v9 = vld [vmem:[%s2925_s3 + $0x58] sm:$0xff] }
  0x2d   :  { %264 = vmatpush2.msra.mxu1 %v115_v52  ;;  %1858 = vmatprep.mubr.msk.f32.mxu1 %vm123_vm0, %v60_v53  ;;  %v314_v10 = vld [vmem:[%s2925_s3 + $0x50] sm:$0xff]  ;;  %v313_v11 = vld [vmem:[%s2925_s3 + $0x48] sm:$0xff]  ;;  %v312_v12 = vld [vmem:[%s2925_s3 + $0x40] sm:$0xff] }
  0x2e   :  { %265 = vmatprep.subr.mxu1 %v2098_v3  ;;  %372 = vmatprep.subr.mxu0 %v319_v5  ;;  %v311_v13 = vld [vmem:[%s2925_s3 + $0x38] sm:$0xff]  ;;  %v310_v14 = vld [vmem:[%s2925_s3 + $0x30] sm:$0xff]  ;;  %v309_v15 = vld [vmem:[%s2925_s3 + $0x28] sm:$0xff] }
  0x2f   :  { %266 = vmatpush2.msra.mxu1 %v114_v54  ;;  %200 = vmatmul.mubr.f32.gmra.mxu0 %v61_v55  ;;  %v308_v16 = vld [vmem:[%s2925_s3 + $0x20] sm:$0xff]  ;;  %v307_v17 = vld [vmem:[%s2925_s3 + $0x18] sm:$0xff]  ;;  %v306_v18 = vld [vmem:[%s2925_s3 + $0x10] sm:$0xff]  ;;  %v343_v55 = vsub.s32 %v340_v48, %v2509_v45 }
  0x30   :  { %267 = vmatprep.subr.mxu1 %v2098_v3  ;;  %420 = vmatprep.mubr.f32.mxu0 %v2098_v3  ;;  %v427_v19 = vld [vmem:[%s2928_s6] sm:$0xf]  ;;  %v305_v20 = vld [vmem:[%s2925_s3 + $0x8] sm:$0xff] }
  0x31   :  { %268 = vmatpush2.msra.mxu1 %v113_v56  ;;  %373 = vmatpush1.msra.mxu0 %v318_v6  ;;  %v304_v21 = vld [vmem:[%s2925_s3] sm:$0xff] }
  0x32   :  { %270 = vmatmul.mubr.f32.vlgmr.msra.gmra.mxu1 %v59_v57  ;;  %464 = vmatprep.subr.mxu1 %v2388_v58  ;;  %v1857_v24 = vld [vmem:[%s2924_s2] ss:$0 sm:$0xff]  ;;  %s2101_s2 = smov 32  }
  0x33   :  { %1859 = vmatprep.mubr.msk.f32.mxu1 %vm123_vm0, %v64_v59  ;;  %465 = vmatpush1.msra.mxu1 %v2397_v60 }
  0x34   :  { %466 = vmatprep.subr.mxu1 %v2403_v61  ;;  %374 = vmatprep.subr.mxu0 %v317_v7 }
  0x35   :  { %467 = vmatpush1.msra.mxu1 %v2409_v62  ;;  %375 = vmatpush1.msra.mxu0 %v316_v8  ;;  %v324_v8 = vsub.s32 0, %v2509_v45 }
  0x36   :  { %275 = vmatmul.mubr.f32.gmra.mxu1 %v63_v63  ;;  %468 = vmatprep.subr.mxu1 %v2419_v0 }
  0x37   :  { %469 = vmatpush1.msra.mxu1 %v2425_v1  ;;  %504 = vmatprep.mubr.f32.mxu1 %v2098_v3 }
  0x38   :  { %470 = vmatprep.subr.mxu1 %v2431_v2  ;;  %376 = vmatprep.subr.mxu0 %v315_v9  ;;  %v320_v9 = vld [vmem:[%s2927_s5] sm:$0x3]  ;;  %s2102_s5 = smov 96  }
  0x39   :  { %471 = vmatpush1.msra.mxu1 %v2437_v4  ;;  %377 = vmatpush1.msra.mxu0 %v314_v10  ;;  %v328_v10 = vsub.s32 1, %v2509_v45 }
  0x3a   :  { %505 = vmatmul.mubr.f32.vlgmr.msra.gmra.mxu1 %v2098_v3  ;;  %592 = vmatprep.subr.mxu1 %v2388_v58 }
  0x3b   :  { %593 = vmatpush1.msra.mxu1 %v2397_v60  ;;  %632 = vmatprep.mubr.f32.mxu1 %v2098_v3 }
  0x3c   :  { %594 = vmatprep.subr.mxu1 %v2403_v61  ;;  %378 = vmatprep.subr.mxu0 %v313_v11  ;;  %v325_v11 = vrot.slane %v320_v9, %v324_v8 }
  0x3d   :  { %595 = vmatpush1.msra.mxu1 %v2409_v62  ;;  %379 = vmatpush1.msra.mxu0 %v312_v12 }
  0x3e   :  { %596 = vmatprep.subr.mxu1 %v2419_v0  ;;  %380 = vmatprep.subr.mxu0 %v311_v13  ;;  %v329_v13 = vrot.slane %v320_v9, %v328_v10 }
  0x3f   :  { %597 = vmatpush1.msra.mxu1 %v2425_v1  ;;  %381 = vmatpush1.msra.mxu0 %v310_v14 }
  0x40   :  { %598 = vmatprep.subr.mxu1 %v2431_v2  ;;  %382 = vmatprep.subr.mxu0 %v309_v15 }
  0x41   :  { %599 = vmatpush1.msra.mxu1 %v2437_v4  ;;  %383 = vmatpush1.msra.mxu0 %v308_v16 }
  0x42   :  { %714 = vmatprep.subr.mxu1 %v2388_v58  ;;  %384 = vmatprep.subr.mxu0 %v307_v17 }
  0x43   :  { %385 = vmatpush1.msra.mxu0 %v306_v18  ;;  %540 = vrot.lane.b32.xlu1 %v427_v19, %s2099_s4 }
  0x44   :  { %386 = vmatprep.subr.mxu0 %v305_v20 }
  0x45   :  { %387 = vmatpush1.msra.mxu0 %v304_v21 }
  0xb5   :  { %v2532_v21 = vpop.permute.xlu1 %540 }
  0xeb   :  { %v1919_v22 = vpop.f32.mrf.mxu0 }
  0xed   :  { %v1920_v23 = vpop.f32.mrf.mxu0 }
  0xee   :  { %v1921_v25 = vadd.f32 %v1920_v23, %v1919_v22 }
  0xef   :  { %v1922_v26 = vpop.f32.mrf.mxu0 }
  0xf0   :  { %v197_v27 = vadd.f32 %v1921_v25, %v1857_v24 }
  0xf1   :  { %v1923_v28 = vpop.f32.mrf.mxu0 }
  0xf2   :  { %v1924_v29 = vadd.f32 %v1923_v28, %v1922_v26  ;;  %v271_v30 = vpop.f32.mrf.mxu1 }
  0xf3   :  { %v272_v31 = vadd.f32 %v271_v30, %v197_v27 }
  0xf4   :  { %v273_v32 = vpop.f32.mrf.mxu1  ;;  %v202_v33 = vadd.f32 %v1924_v29, %v1857_v24 }
  0xf5   :  { %v280_v34 = vmax.f32 %v272_v31, 0.0 }
  0xf6   :  { %v276_v36 = vpop.f32.mrf.mxu1 }
  0xf7   :  { %v284_v37 = vcombine.high %v280_v34, %v280_v34  ;;  %v277_v40 = vadd.f32 %v276_v36, %v202_v33  ;;  %v1860_v42 = vrot.slane %v280_v34, 10 }
  0xf8   :  { %v278_v41 = vpop.f32.mrf.mxu1 }
  0xf9   :  { %v1861_v43 = vrot.slane %v284_v37, 10  ;;  %v281_v44 = vmax.f32 %v277_v40, 0.0  ;;  %v300_v52 = vmax.f32 %v280_v34, %v1860_v42 }
  0xfa   :  { %v506_v46 = vpop.f32.mrf.mxu1 }
  0xfb   :  { %v301_v47 = vmax.f32 %v284_v37, %v1861_v43  ;;  %v285_v49 = vcombine.high %v281_v44, %v281_v44  ;;  %v1862_v50 = vrot.slane %v281_v44, 10  ;;  %513 = vrot.lane.b32.xlu0 %v506_v46, %s2101_s2 }
  0xfc   :  { %v508_v51 = vpop.f32.mrf.mxu1 }
  0xfd   :  { %v1863_v53 = vrot.slane %v285_v49, 10  ;;  %v336_v54 = vcombine.low %v300_v52, %v301_v47  ;;  %v302_v56 = vmax.f32 %v281_v44, %v1862_v50 }
  0xff   :  { %v303_v57 = vmax.f32 %v285_v49, %v1863_v53  ;;  %515 = vrot.lane.b32.xlu0 %v508_v51, %s2101_s2  ;;  %v344_v63 = vrot.slane %v336_v54, %v343_v55 }
 0x101   :  { %v337_v59 = vcombine.low %v302_v56, %v303_v57 }
 0x103   :  { %v351_v5 = vrot.slane %v337_v59, %v343_v55 }
 0x105   :  { %v352_v6 = vcombine.low %v344_v63, %v351_v5 }
 0x107   :  { %1864 = vmatmul.mubr.msk.f32.vlgmr.msra.gmra.mxu0 %vm353_vm1, %v352_v6 }
 0x108   :  { %1029 = vmatprep.mubr.f32.mxu0 %v2098_v3 }
 0x16d   :  { %v514_v7 = vpop.permute.xlu0 %513 }
 0x171   :  { %v516_v12 = vpop.permute.xlu0 %515 }
 0x172   :  { %v517_v15 = vsel %vm436_vm2, %v514_v7, %v516_v12 }
 0x173   :  { %v520_v20 = vsel %vm519_vm3, %v506_v46, %v517_v15 }
 0x174   :  { %v543_v23 = vadd.f32 %v2532_v21, %v520_v20 }
 0x1c7   :  { %v422_v14 = vpop.f32.mrf.mxu0 }
 0x1c8   :  { %v2526_v16 = vadd.f32 %v422_v14, %v325_v11 }
 0x1c9   :  { %v424_v17 = vpop.f32.mrf.mxu0 }
 0x1ca   :  { %v2528_v18 = vadd.f32 %v424_v17, %v329_v13  ;;  %v523_v19 = vrot.slane %v2526_v16, 4  ;;  %v648_v47 = vrot.slane %v2526_v16, 2 }
 0x1cc   :  { %525 = vrot.lane.b32.xlu1 %v523_v19, %s2101_s2  ;;  %v524_v22 = vrot.slane %v2528_v18, 4  ;;  %v650_v48 = vrot.slane %v2528_v18, 2 }
 0x1ce   :  { %527 = vrot.lane.b32.xlu0 %v524_v22, %s2101_s2 }
 0x1d0   :  { %545 = vrot.lane.b32.xlu1 %v543_v23, %s2099_s4 }
 0x23e   :  { %v526_v24 = vpop.permute.xlu1 %525 }
 0x240   :  { %v528_v25 = vpop.permute.xlu0 %527 }
 0x241   :  { %v529_v26 = vsel %vm436_vm2, %v526_v24, %v528_v25 }
 0x242   :  { %v531_v27 = vsel %vm519_vm3, %v2526_v16, %v529_v26  ;;  %v546_v33 = vpop.permute.xlu1 %545 }
 0x243   :  { %v532_v28 = vadd.f32 %v531_v27, %v520_v20 }
 0x245   :  { %v1865_v29 = vmul.f32 -1.442695, %v532_v28 }
 0x247   :  { %2016 = vpow2.f32 %v1865_v29 }
 0x254   :  { %v2017_v30 = vpop.eup %2016 }
 0x255   :  { %v536_v31 = vadd.f32 1.0, %v2017_v30 }
 0x257   :  { %2018 = vrcp.f32 %v536_v31 }
 0x264   :  { %v2019_v32 = vpop.eup %2018 }
 0x265   :  { %v548_v34 = vmul.f32 %v2019_v32, %v546_v33  ;;  %v555_v38 = vsub.f32 1.0, %v2019_v32  ;;  %v561_v40 = vmul.f32 0.0, %v2019_v32 }
 0x267   :  { %550 = vrot.lane.b32.xlu0 %v548_v34, %s2099_s4 }
 0x2d9   :  { %v551_v35 = vpop.permute.xlu0 %550 }
 0x2da   :  { %v553_v36 = vadd.f32 %v551_v35, %v531_v27 }
 0x2dc   :  { %2020 = vtanh.f32 %v553_v36 }
 0x2e9   :  { %v2021_v37 = vpop.eup %2020 }
 0x2ea   :  { %557 = vrot.lane.b32.xlu1 %v2021_v37, %s2102_s5 }
 0x35c   :  { %v558_v39 = vpop.permute.xlu1 %557 }
 0x35d   :  { %v560_v41 = vmul.f32 %v558_v39, %v555_v38 }
 0x35f   :  { %v2546_v42 = vadd.f32 %v561_v40, %v560_v41 }
 0x361   :  { %564 = vrot.lane.b32.xlu0 %v2546_v42, %s2102_s5 }
 0x3d3   :  { %v565_v43 = vpop.permute.xlu0 %564 }
 0x3d4   :  { %1866 = vmatmul.mubr.msk.f32.vlgmr.msra.gmra.mxu1 %vm436_vm2, %v565_v43 }
 0x3d5   :  { %715 = vmatpush1.msra.mxu1 %v2397_v60  ;;  %754 = vmatprep.mubr.f32.mxu1 %v2098_v3 }
 0x3d6   :  { %716 = vmatprep.subr.mxu1 %v2403_v61 }
 0x3d7   :  { %717 = vmatpush1.msra.mxu1 %v2409_v62 }
 0x3d8   :  { %718 = vmatprep.subr.mxu1 %v2419_v0 }
 0x3d9   :  { %719 = vmatpush1.msra.mxu1 %v2425_v1 }
 0x3da   :  { %720 = vmatprep.subr.mxu1 %v2431_v2 }
 0x3db   :  { %721 = vmatpush1.msra.mxu1 %v2437_v4 }
 0x3dc   :  { %834 = vmatprep.subr.mxu1 %v2388_v58 }
 0x494   :  { %v634_v44 = vpop.f32.mrf.mxu1 }
 0x495   :  { %641 = vrot.lane.b32.xlu1 %v634_v44, %s2101_s2 }
 0x496   :  { %v636_v46 = vpop.f32.mrf.mxu1 }
 0x497   :  { %643 = vrot.lane.b32.xlu0 %v636_v46, %s2101_s2 }
 0x499   :  { %651 = vrot.lane.b32.xlu1 %v648_v47, %s2101_s2 }
 0x49b   :  { %653 = vrot.lane.b32.xlu0 %v650_v48, %s2101_s2  ;;  %v892_v48 = vrot.slane %v2528_v18, 6 }
 0x507   :  { %v642_v49 = vpop.permute.xlu1 %641 }
 0x509   :  { %v644_v50 = vpop.permute.xlu0 %643 }
 0x50a   :  { %v645_v51 = vsel %vm436_vm2, %v642_v49, %v644_v50 }
 0x50b   :  { %v647_v58 = vsel %vm519_vm3, %v634_v44, %v645_v51  ;;  %v652_v54 = vpop.permute.xlu1 %651 }
 0x50c   :  { %v665_v52 = vadd.f32 %v647_v58, %v2532_v21 }
 0x50d   :  { %v654_v53 = vpop.permute.xlu0 %653 }
 0x50e   :  { %667 = vrot.lane.b32.xlu1 %v665_v52, %s2099_s4  ;;  %v655_v55 = vsel %vm436_vm2, %v652_v54, %v654_v53 }
 0x50f   :  { %v657_v56 = vsel %vm519_vm3, %v648_v47, %v655_v55  ;;  %v890_v47 = vrot.slane %v2526_v16, 6 }
 0x510   :  { %v658_v57 = vadd.f32 %v657_v56, %v647_v58 }
 0x512   :  { %v1867_v59 = vmul.f32 -1.442695, %v658_v57 }
 0x514   :  { %2022 = vpow2.f32 %v1867_v59 }
 0x521   :  { %v2023_v63 = vpop.eup %2022 }
 0x522   :  { %v662_v5 = vadd.f32 1.0, %v2023_v63 }
 0x524   :  { %2024 = vrcp.f32 %v662_v5 }
 0x531   :  { %v2025_v6 = vpop.eup %2024 }
 0x532   :  { %v677_v14 = vsub.f32 1.0, %v2025_v6  ;;  %v683_v17 = vmul.f32 %v2025_v6, %v2546_v42 }
 0x580   :  { %v668_v7 = vpop.permute.xlu1 %667 }
 0x581   :  { %v670_v9 = vmul.f32 %v2025_v6, %v668_v7 }
 0x583   :  { %672 = vrot.lane.b32.xlu0 %v670_v9, %s2099_s4  ;;  %v951_v9 = vld [vmem:[%s2929_s7 + $0x38] sm:$0xff] }
 0x5f5   :  { %v673_v11 = vpop.permute.xlu0 %672 }
 0x5f6   :  { %v675_v12 = vadd.f32 %v673_v11, %v657_v56  ;;  %v959_v11 = vld [vmem:[%s2930_s8 + $0x38] sm:$0xff] }
 0x5f7   :  { %989 = vmatprep.subr.mxu0 %v959_v11 }
 0x5f8   :  { %2026 = vtanh.f32 %v675_v12  ;;  %v950_v12 = vld [vmem:[%s2929_s7 + $0x30] sm:$0xff] }
 0x605   :  { %v2027_v13 = vpop.eup %2026 }
 0x606   :  { %679 = vrot.lane.b32.xlu1 %v2027_v13, %s2102_s5  ;;  %v958_v13 = vld [vmem:[%s2930_s8 + $0x30] sm:$0xff] }
 0x607   :  { %990 = vmatpush1.msra.mxu0 %v958_v13 }
 0x678   :  { %v680_v15 = vpop.permute.xlu1 %679 }
 0x679   :  { %v682_v20 = vmul.f32 %v680_v15, %v677_v14  ;;  %v949_v14 = vld [vmem:[%s2929_s7 + $0x28] sm:$0xff] }
 0x67a   :  { %v957_v15 = vld [vmem:[%s2930_s8 + $0x28] sm:$0xff] }
 0x67b   :  { %v2575_v22 = vadd.f32 %v683_v17, %v682_v20  ;;  %v948_v17 = vld [vmem:[%s2929_s7 + $0x20] sm:$0xff]  ;;  %991 = vmatprep.subr.mxu0 %v957_v15 }
 0x67c   :  { %v956_v20 = vld [vmem:[%s2930_s8 + $0x20] sm:$0xff] }
 0x67d   :  { %686 = vrot.lane.b32.xlu0 %v2575_v22, %s2102_s5  ;;  %992 = vmatpush1.msra.mxu0 %v956_v20 }
 0x6ef   :  { %v687_v23 = vpop.permute.xlu0 %686 }
 0x6f0   :  { %1868 = vmatmul.mubr.msk.f32.vlgmr.msra.gmra.mxu1 %vm436_vm2, %v687_v23  ;;  %v947_v23 = vld [vmem:[%s2929_s7 + $0x18] sm:$0xff] }
 0x6f1   :  { %835 = vmatpush1.msra.mxu1 %v2397_v60  ;;  %874 = vmatprep.mubr.f32.mxu1 %v2098_v3 }
 0x6f2   :  { %836 = vmatprep.subr.mxu1 %v2403_v61 }
 0x6f3   :  { %837 = vmatpush1.msra.mxu1 %v2409_v62 }
 0x6f4   :  { %838 = vmatprep.subr.mxu1 %v2419_v0 }
 0x6f5   :  { %839 = vmatpush1.msra.mxu1 %v2425_v1 }
 0x6f6   :  { %840 = vmatprep.subr.mxu1 %v2431_v2 }
 0x6f7   :  { %841 = vmatpush1.msra.mxu1 %v2437_v4 }
 0x6f8   :  { %1065 = vmatprep.subr.mxu1 %v951_v9 }
 0x7b0   :  { %v756_v24 = vpop.f32.mrf.mxu1 }
 0x7b1   :  { %763 = vrot.lane.b32.xlu1 %v756_v24, %s2101_s2 }
 0x7b2   :  { %v758_v25 = vpop.f32.mrf.mxu1 }
 0x7b3   :  { %765 = vrot.lane.b32.xlu0 %v758_v25, %s2101_s2  ;;  %v955_v25 = vld [vmem:[%s2930_s8 + $0x18] sm:$0xff] }
 0x7b4   :  { %993 = vmatprep.subr.mxu0 %v955_v25 }
 0x7b5   :  { %771 = vrot.lane.b32.xlu1 %v2526_v16, %s2101_s2 }
 0x7b7   :  { %773 = vrot.lane.b32.xlu0 %v2528_v18, %s2101_s2 }
 0x823   :  { %v764_v60 = vpop.permute.xlu1 %763 }
 0x825   :  { %v766_v61 = vpop.permute.xlu0 %765 }
 0x826   :  { %v767_v62 = vsel %vm436_vm2, %v764_v60, %v766_v61  ;;  %v946_v60 = vld [vmem:[%s2929_s7 + $0x10] sm:$0xff] }
 0x827   :  { %v769_v0 = vsel %vm519_vm3, %v756_v24, %v767_v62  ;;  %v772_v4 = vpop.permute.xlu1 %771  ;;  %v954_v61 = vld [vmem:[%s2930_s8 + $0x10] sm:$0xff]  ;;  %v945_v62 = vld [vmem:[%s2929_s7 + $0x8] sm:$0xff] }
 0x828   :  { %v785_v1 = vadd.f32 %v769_v0, %v2532_v21  ;;  %994 = vmatpush1.msra.mxu0 %v954_v61 }
 0x829   :  { %v774_v2 = vpop.permute.xlu0 %773 }
 0x82a   :  { %787 = vrot.lane.b32.xlu1 %v785_v1, %s2099_s4  ;;  %v775_v26 = vsel %vm436_vm2, %v772_v4, %v774_v2  ;;  %v944_v1 = vld [vmem:[%s2929_s7] sm:$0xff]  ;;  %v1133_v4 = vld [vmem:[%s2931_s9 + $0x38] sm:$0xff] }
 0x82b   :  { %v777_v27 = vsel %vm519_vm3, %v523_v19, %v775_v26  ;;  %v952_v2 = vld [vmem:[%s2930_s8] sm:$0xff] }
 0x82c   :  { %v778_v28 = vadd.f32 %v777_v27, %v769_v0  ;;  %v953_v0 = vld [vmem:[%s2930_s8 + $0x8] sm:$0xff] }
 0x82d   :  { %995 = vmatprep.subr.mxu0 %v953_v0 }
 0x82e   :  { %v1869_v29 = vmul.f32 -1.442695, %v778_v28  ;;  %996 = vmatpush1.msra.mxu0 %v952_v2  ;;  %v927_v28 = vrot.slane %v2575_v22, 6 }
 0x82f   :  { %1158 = vmatprep.subr.mxu0 %v1133_v4 }
 0x830   :  { %2028 = vpow2.f32 %v1869_v29 }
 0x83d   :  { %v2029_v30 = vpop.eup %2028 }
 0x83e   :  { %v782_v31 = vadd.f32 1.0, %v2029_v30 }
 0x840   :  { %2030 = vrcp.f32 %v782_v31 }
 0x84d   :  { %v2031_v32 = vpop.eup %2030 }
 0x84e   :  { %v797_v38 = vsub.f32 1.0, %v2031_v32  ;;  %v803_v19 = vmul.f32 %v2031_v32, %v2575_v22 }
 0x89c   :  { %v788_v33 = vpop.permute.xlu1 %787 }
 0x89d   :  { %v790_v34 = vmul.f32 %v2031_v32, %v788_v33 }
 0x89f   :  { %792 = vrot.lane.b32.xlu0 %v790_v34, %s2099_s4  ;;  %v934_v34 = vsel %vm519_vm3, %v2546_v42, %v927_v28 }
 0x911   :  { %v793_v35 = vpop.permute.xlu0 %792 }
 0x912   :  { %v795_v36 = vadd.f32 %v793_v35, %v777_v27 }
 0x914   :  { %2032 = vtanh.f32 %v795_v36 }
 0x921   :  { %v2033_v37 = vpop.eup %2032 }
 0x922   :  { %799 = vrot.lane.b32.xlu1 %v2033_v37, %s2102_s5  ;;  %v939_v37 = vrot.slane %v2546_v42, 4  ;;  %v2695_v42 = vld [vmem:[%s2931_s9 + $0x28] sm:$0xff] }
 0x994   :  { %v800_v39 = vpop.permute.xlu1 %799 }
 0x995   :  { %v802_v40 = vmul.f32 %v800_v39, %v797_v38 }
 0x997   :  { %v2605_v41 = vadd.f32 %v803_v19, %v802_v40  ;;  %v2690_v40 = vld [vmem:[%s2931_s9 + $0x30] sm:$0xff] }
 0x999   :  { %806 = vrot.lane.b32.xlu0 %v2605_v41, %s2102_s5  ;;  %v929_v31 = vrot.slane %v2605_v41, 4 }
 0x99b   :  { %v936_v35 = vsel %vm935_vm4, %v934_v34, %v929_v31 }
 0xa0b   :  { %v807_v43 = vpop.permute.xlu0 %806 }
 0xa0c   :  { %1870 = vmatmul.mubr.msk.f32.vlgmr.msra.gmra.mxu1 %vm436_vm2, %v807_v43 }
 0xa0d   :  { %1105 = vmatprep.mubr.f32.mxu1 %v2098_v3  ;;  %1066 = vmatpush1.msra.mxu1 %v950_v12 }
 0xa0e   :  { %1067 = vmatprep.subr.mxu1 %v949_v14 }
 0xa0f   :  { %1068 = vmatpush1.msra.mxu1 %v948_v17 }
 0xa10   :  { %1069 = vmatprep.subr.mxu1 %v947_v23 }
 0xa11   :  { %1070 = vmatpush1.msra.mxu1 %v946_v60 }
 0xa12   :  { %1071 = vmatprep.subr.mxu1 %v945_v62 }
 0xa13   :  { %1072 = vmatpush1.msra.mxu1 %v944_v1 }
 0xa14   :  { %1264 = vmatprep.subr.mxu1 %v1133_v4 }
 0xacc   :  { %v876_v44 = vpop.f32.mrf.mxu1 }
 0xacd   :  { %883 = vrot.lane.b32.xlu1 %v876_v44, %s2101_s2 }
 0xace   :  { %v878_v46 = vpop.f32.mrf.mxu1 }
 0xacf   :  { %885 = vrot.lane.b32.xlu0 %v878_v46, %s2101_s2  ;;  %v2717_v46 = vld [vmem:[%s2931_s9 + $0x10] sm:$0xff] }
 0xad1   :  { %893 = vrot.lane.b32.xlu1 %v890_v47, %s2101_s2 }
 0xad3   :  { %895 = vrot.lane.b32.xlu0 %v892_v48, %s2101_s2  ;;  %v2731_v48 = vld [vmem:[%s2931_s9] sm:$0xff] }
 0xb3f   :  { %v884_v49 = vpop.permute.xlu1 %883 }
 0xb41   :  { %v886_v50 = vpop.permute.xlu0 %885 }
 0xb42   :  { %v887_v51 = vsel %vm436_vm2, %v884_v49, %v886_v50  ;;  %v1112_v49 = vld [vmem:[%s2932_s10] sm:$0x3] }
 0xb43   :  { %v889_v58 = vsel %vm519_vm3, %v876_v44, %v887_v51  ;;  %v894_v54 = vpop.permute.xlu1 %893  ;;  %v2710_v44 = vld [vmem:[%s2931_s9 + $0x18] sm:$0xff]  ;;  %v1117_v51 = vrot.slane %v1112_v49, %v324_v8 }
 0xb44   :  { %v907_v52 = vadd.f32 %v889_v58, %v2532_v21 }
 0xb45   :  { %v896_v53 = vpop.permute.xlu0 %895 }
 0xb46   :  { %909 = vrot.lane.b32.xlu1 %v907_v52, %s2099_s4  ;;  %v897_v16 = vsel %vm436_vm2, %v894_v54, %v896_v53  ;;  %v1121_v53 = vrot.slane %v1112_v49, %v328_v10 }
 0xb47   :  { %v899_v55 = vsel %vm519_vm3, %v890_v47, %v897_v16  ;;  %v2724_v47 = vld [vmem:[%s2931_s9 + $0x8] sm:$0xff] }
 0xb48   :  { %v900_v56 = vadd.f32 %v899_v55, %v889_v58 }
 0xb4a   :  { %v1871_v18 = vmul.f32 -1.442695, %v900_v56 }
 0xb4c   :  { %2034 = vpow2.f32 %v1871_v18 }
 0xb59   :  { %v2035_v57 = vpop.eup %2034 }
 0xb5a   :  { %v904_v59 = vadd.f32 1.0, %v2035_v57 }
 0xb5c   :  { %2036 = vrcp.f32 %v904_v59 }
 0xb69   :  { %v2037_v63 = vpop.eup %2036 }
 0xb6a   :  { %v919_v26 = vsub.f32 1.0, %v2037_v63  ;;  %v925_v29 = vmul.f32 %v2037_v63, %v2605_v41 }
 0xbb8   :  { %v910_v5 = vpop.permute.xlu1 %909 }
 0xbb9   :  { %v912_v6 = vmul.f32 %v2037_v63, %v910_v5 }
 0xbbb   :  { %914 = vrot.lane.b32.xlu0 %v912_v6, %s2099_s4 }
 0xc2d   :  { %v915_v21 = vpop.permute.xlu0 %914 }
 0xc2e   :  { %v917_v7 = vadd.f32 %v915_v21, %v899_v55 }
 0xc30   :  { %2038 = vtanh.f32 %v917_v7 }
 0xc3d   :  { %v2039_v24 = vpop.eup %2038 }
 0xc3e   :  { %921 = vrot.lane.b32.xlu1 %v2039_v24, %s2102_s5 }
 0xcb0   :  { %v922_v27 = vpop.permute.xlu1 %921 }
 0xcb1   :  { %v924_v30 = vmul.f32 %v922_v27, %v919_v26 }
 0xcb3   :  { %v926_v32 = vadd.f32 %v925_v29, %v924_v30 }
 0xcb5   :  { %v932_v33 = vrot.slane %v926_v32, 2 }
 0xcb7   :  { %v938_v36 = vsel %vm937_vm5, %v936_v35, %v932_v33  ;;  %v941_v38 = vsel %vm519_vm3, %v932_v33, %v2605_v41  ;;  %v2703_v41 = vld [vmem:[%s2931_s9 + $0x20] sm:$0xff] }
 0xcb8   :  { %1037 = vrot.lane.b32.xlu1 %v938_v36, %s2102_s5  ;;  %v942_v22 = vsel %vm935_vm4, %v941_v38, %v927_v28 }
 0xcb9   :  { %v943_v39 = vsel %vm937_vm5, %v942_v22, %v939_v37 }
 0xcba   :  { %961 = vrot.lane.b32.xlu0 %v943_v39, %s2102_s5 }
 0xd2a   :  { %v1038_v19 = vpop.permute.xlu1 %1037 }
 0xd2b   :  { %1873 = vmatmul.mubr.msk.f32.vlgmr.msra.gmra.mxu1 %vm436_vm2, %v1038_v19 }
 0xd2c   :  { %v962_v43 = vpop.permute.xlu0 %961  ;;  %1265 = vmatpush1.msra.mxu1 %v2690_v40  ;;  %1304 = vmatprep.mubr.f32.mxu1 %v2098_v3 }
 0xd2d   :  { %1872 = vmatmul.mubr.msk.f32.vlgmr.msra.gmra.mxu0 %vm436_vm2, %v962_v43  ;;  %1266 = vmatprep.subr.mxu1 %v2695_v42 }
 0xd2e   :  { %1159 = vmatpush1.msra.mxu0 %v2690_v40  ;;  %1198 = vmatprep.mubr.f32.mxu0 %v2098_v3 }
 0xd2f   :  { %1160 = vmatprep.subr.mxu0 %v2695_v42  ;;  %1267 = vmatpush1.msra.mxu1 %v2703_v41 }
 0xd30   :  { %1161 = vmatpush1.msra.mxu0 %v2703_v41  ;;  %1268 = vmatprep.subr.mxu1 %v2710_v44 }
 0xd31   :  { %1162 = vmatprep.subr.mxu0 %v2710_v44  ;;  %1269 = vmatpush1.msra.mxu1 %v2717_v46 }
 0xd32   :  { %1163 = vmatpush1.msra.mxu0 %v2717_v46  ;;  %1270 = vmatprep.subr.mxu1 %v2724_v47 }
 0xd33   :  { %1164 = vmatprep.subr.mxu0 %v2724_v47  ;;  %1271 = vmatpush1.msra.mxu1 %v2731_v48 }
 0xd34   :  { %1165 = vmatpush1.msra.mxu0 %v2731_v48  ;;  %1477 = vmatprep.subr.mxu1 %v1133_v4 }
 0xd35   :  { %1199 = vmatmul.mubr.f32.vlgmr.msra.gmra.mxu0 %v2098_v3  ;;  %1372 = vmatprep.subr.mxu0 %v1133_v4 }
 0xd36   :  { %1373 = vmatpush1.msra.mxu0 %v2690_v40  ;;  %1412 = vmatprep.mubr.f32.mxu0 %v2098_v3 }
 0xd37   :  { %1374 = vmatprep.subr.mxu0 %v2695_v42 }
 0xd38   :  { %1375 = vmatpush1.msra.mxu0 %v2703_v41 }
 0xd39   :  { %1376 = vmatprep.subr.mxu0 %v2710_v44 }
 0xd3a   :  { %1377 = vmatpush1.msra.mxu0 %v2717_v46 }
 0xd3b   :  { %1378 = vmatprep.subr.mxu0 %v2724_v47 }
 0xd3c   :  { %1379 = vmatpush1.msra.mxu0 %v2731_v48 }
 0xd3d   :  { %1952 = vmatprep.subr.mxu0 %v2098_v3 }
 0xdeb   :  { %v1107_v50 = vpop.f32.mrf.mxu1 }
 0xded   :  { %v1031_v58 = vpop.f32.mrf.mxu0  ;;  %v1109_v54 = vpop.f32.mrf.mxu1 }
 0xdee   :  { %v1108_v52 = vadd.f32 %v1107_v50, %v1031_v58 }
 0xdef   :  { %v1033_v16 = vpop.f32.mrf.mxu0 }
 0xdf0   :  { %v1124_v55 = vadd.f32 %v1117_v51, %v1108_v52  ;;  %v1110_v56 = vadd.f32 %v1109_v54, %v1033_v16 }
 0xdf2   :  { %v1125_v18 = vadd.f32 %v1121_v53, %v1110_v56  ;;  %v1420_v57 = vrot.slane %v1124_v55, 4  ;;  %v1313_v59 = vrot.slane %v1124_v55, 2  ;;  %v1525_v63 = vrot.slane %v1124_v55, 6 }
 0xdf4   :  { %v1207_v5 = vrot.slane %v1125_v18, 4  ;;  %v1315_v6 = vrot.slane %v1125_v18, 2  ;;  %v2757_v21 = vsel %vm519_vm3, %v1420_v57, %v1125_v18  ;;  %v1527_v7 = vrot.slane %v1125_v18, 6 }
 0xdf5   :  { %v1200_v8 = vpop.f32.mrf.mxu0 }
 0xdf6   :  { %v1209_v9 = vsel %vm519_vm3, %v1124_v55, %v1207_v5  ;;  %v1317_v45 = vsel %vm519_vm3, %v1313_v59, %v1315_v6  ;;  %v2762_v10 = vsel %vm519_vm3, %v1525_v63, %v1527_v7 }
 0xdf7   :  { %v1202_v11 = vpop.f32.mrf.mxu0 }
 0xdf8   :  { %v1205_v12 = vsel %vm519_vm3, %v1200_v8, %v1202_v11 }
 0xdf9   :  { %v1210_v13 = vadd.f32 %v1209_v9, %v1205_v12 }
 0xdfb   :  { %2040 = vtanh.f32 %v1210_v13  ;;  %v1874_v15 = vmul.f32 -1.442695, %v1210_v13 }
 0xdfd   :  { %2042 = vpow2.f32 %v1874_v15 }
 0xe08   :  { %v2041_v14 = vpop.eup %2040 }
 0xe09   :  { %1220 = vrot.lane.b32.xlu0 %v2041_v14, %s2099_s4 }
 0xe0a   :  { %v2043_v17 = vpop.eup %2042 }
 0xe0b   :  { %v1214_v20 = vadd.f32 1.0, %v2043_v17  ;;  %v1570_v17 = vld [vmem:[%s2933_s11 + $0x30] sm:$0xff] }
 0xe0d   :  { %2044 = vrcp.f32 %v1214_v20  ;;  %v1569_v20 = vld [vmem:[%s2933_s11 + $0x28] sm:$0xff] }
 0xe1a   :  { %v2045_v23 = vpop.eup %2044 }
 0xe1b   :  { %v1218_v60 = vmul.f32 0.0, %v2045_v23 }
 0xe7b   :  { %v1221_v24 = vpop.permute.xlu0 %1220 }
 0xe7c   :  { %v1223_v25 = vmul.f32 %v2045_v23, %v1221_v24  ;;  %v1567_v24 = vld [vmem:[%s2933_s11 + $0x18] sm:$0xff] }
 0xe7e   :  { %1225 = vrot.lane.b32.xlu1 %v1223_v25, %s2101_s2  ;;  %v1566_v25 = vld [vmem:[%s2933_s11 + $0x10] sm:$0xff] }
 0xef0   :  { %v1226_v61 = vpop.permute.xlu1 %1225 }
 0xef1   :  { %v1228_v62 = vadd.f32 %v1226_v61, %v1218_v60  ;;  %v1565_v61 = vld [vmem:[%s2933_s11 + $0x8] sm:$0xff] }
 0xef3   :  { %2046 = vtanh.f32 %v1228_v62 }
 0xf00   :  { %v2047_v0 = vpop.eup %2046 }
 0xf01   :  { %1231 = vrot.lane.b32.xlu0 %v2047_v0, %s2099_s4  ;;  %v1564_v0 = vld [vmem:[%s2933_s11] sm:$0xff] }
 0xf73   :  { %v1232_v1 = vpop.permute.xlu0 %1231 }
 0xf74   :  { %v2768_v2 = vmul.f32 %v2045_v23, %v1232_v1  ;;  %v1568_v23 = vld [vmem:[%s2933_s11 + $0x20] sm:$0xff]  ;;  %v1660_v1 = vld [vmem:[%s2935_s13 + $0x38] sm:$0xff] }
 0xf76   :  { %1236 = vrot.lane.b32.xlu1 %v2768_v2, %s2101_s2 }
 0xfe8   :  { %v1237_v4 = vpop.permute.xlu1 %1236 }
 0xfe9   :  { %1875 = vmatmul.mubr.msk.f32.vlgmr.msra.gmra.mxu1 %vm436_vm2, %v1237_v4  ;;  %v1658_v4 = vld [vmem:[%s2935_s13 + $0x28] sm:$0xff] }
 0xfea   :  { %1478 = vmatpush1.msra.mxu1 %v2690_v40  ;;  %1517 = vmatprep.mubr.f32.mxu1 %v2098_v3 }
 0xfeb   :  { %1479 = vmatprep.subr.mxu1 %v2695_v42 }
 0xfec   :  { %1480 = vmatpush1.msra.mxu1 %v2703_v41 }
 0xfed   :  { %1481 = vmatprep.subr.mxu1 %v2710_v44 }
 0xfee   :  { %1482 = vmatpush1.msra.mxu1 %v2717_v46 }
 0xfef   :  { %1483 = vmatprep.subr.mxu1 %v2724_v47 }
 0xff0   :  { %1484 = vmatpush1.msra.mxu1 %v2731_v48 }
 0xff1   :  { %1971 = vmatprep.subr.mxu1 %v2098_v3 }
0x10a9   :  { %v1306_v26 = vpop.f32.mrf.mxu1 }
0x10ab   :  { %v1308_v27 = vpop.f32.mrf.mxu1 }
0x10ac   :  { %v1311_v28 = vsel %vm519_vm3, %v1306_v26, %v1308_v27  ;;  %v1657_v26 = vld [vmem:[%s2935_s13 + $0x20] sm:$0xff]  ;;  %v1656_v27 = vld [vmem:[%s2935_s13 + $0x18] sm:$0xff] }
0x10ad   :  { %v1318_v29 = vadd.f32 %v1317_v45, %v1311_v28 }
0x10af   :  { %2048 = vtanh.f32 %v1318_v29  ;;  %v1876_v31 = vmul.f32 -1.442695, %v1318_v29 }
0x10b1   :  { %2050 = vpow2.f32 %v1876_v31 }
0x10bc   :  { %v2049_v30 = vpop.eup %2048 }
0x10bd   :  { %1328 = vrot.lane.b32.xlu0 %v2049_v30, %s2099_s4 }
0x10be   :  { %v2051_v32 = vpop.eup %2050 }
0x10bf   :  { %v1322_v33 = vadd.f32 1.0, %v2051_v32 }
0x10c1   :  { %2052 = vrcp.f32 %v1322_v33  ;;  %v1655_v33 = vld [vmem:[%s2935_s13 + $0x10] sm:$0xff] }
0x10ce   :  { %v2053_v34 = vpop.eup %2052 }
0x10cf   :  { %v1326_v37 = vmul.f32 %v2053_v34, %v1228_v62  ;;  %v1559_v62 = vrot.slane %v2768_v2, 2  ;;  %v1659_v2 = vld [vmem:[%s2935_s13 + $0x30] sm:$0xff] }
0x112f   :  { %v1329_v35 = vpop.permute.xlu0 %1328 }
0x1130   :  { %v1331_v36 = vmul.f32 %v2053_v34, %v1329_v35  ;;  %v1653_v35 = vld [vmem:[%s2935_s13] sm:$0xff] }
0x1132   :  { %1333 = vrot.lane.b32.xlu1 %v1331_v36, %s2101_s2  ;;  %v1749_v36 = vld [vmem:[%s2937_s15 + $0x38] sm:$0xff] }
0x11a4   :  { %v1334_v38 = vpop.permute.xlu1 %1333 }
0x11a5   :  { %v1336_v22 = vadd.f32 %v1334_v38, %v1326_v37  ;;  %v1748_v37 = vld [vmem:[%s2937_s15 + $0x30] sm:$0xff]  ;;  %v1747_v38 = vld [vmem:[%s2937_s15 + $0x28] sm:$0xff] }
0x11a7   :  { %2054 = vtanh.f32 %v1336_v22 }
0x11b4   :  { %v2055_v39 = vpop.eup %2054 }
0x11b5   :  { %1339 = vrot.lane.b32.xlu0 %v2055_v39, %s2099_s4  ;;  %v1745_v39 = vld [vmem:[%s2937_s15 + $0x18] sm:$0xff] }
0x1227   :  { %v1340_v19 = vpop.permute.xlu0 %1339 }
0x1228   :  { %v1342_v40 = vmul.f32 %v2053_v34, %v1340_v19  ;;  %v1654_v34 = vld [vmem:[%s2935_s13 + $0x8] sm:$0xff]  ;;  %v1881_v19 = vld [vmem:[%s2934_s12] ss:$0 sm:$0xff] }
0x122a   :  { %1344 = vrot.lane.b32.xlu1 %v1342_v40, %s2101_s2 }
0x129c   :  { %v1345_v43 = vpop.permute.xlu1 %1344 }
0x129d   :  { %1877 = vmatmul.mubr.msk.f32.vlgmr.msra.gmra.mxu0 %vm436_vm2, %v1345_v43 }
0x129e   :  { %1968 = vmatprep.mubr.msk.f32.mxu0 %vm2103_vm6, %v2098_v3 }
0x135d   :  { %v1414_v42 = vpop.f32.mrf.mxu0 }
0x135f   :  { %v1416_v41 = vpop.f32.mrf.mxu0 }
0x1360   :  { %v1419_v44 = vsel %vm519_vm3, %v1414_v42, %v1416_v41 }
0x1361   :  { %v1423_v46 = vadd.f32 %v2757_v21, %v1419_v44  ;;  %v1744_v44 = vld [vmem:[%s2937_s15 + $0x10] sm:$0xff] }
0x1363   :  { %2056 = vtanh.f32 %v1423_v46  ;;  %v1878_v48 = vmul.f32 -1.442695, %v1423_v46  ;;  %v1743_v46 = vld [vmem:[%s2937_s15 + $0x8] sm:$0xff] }
0x1365   :  { %2058 = vpow2.f32 %v1878_v48  ;;  %v1883_v48 = vld [vmem:[%s2936_s14] ss:$0 sm:$0xff]  ;;  %s2104_s14 = smov [#allocation2]  }
0x1370   :  { %v2057_v47 = vpop.eup %2056 }
0x1371   :  { %1433 = vrot.lane.b32.xlu0 %v2057_v47, %s2099_s4  ;;  %v1742_v47 = vld [vmem:[%s2937_s15] sm:$0xff] }
0x1372   :  { %v2059_v49 = vpop.eup %2058 }
0x1373   :  { %v1427_v50 = vadd.f32 1.0, %v2059_v49 }
0x1375   :  { %2060 = vrcp.f32 %v1427_v50 }
0x1382   :  { %v2061_v51 = vpop.eup %2060 }
0x1383   :  { %v1431_v53 = vmul.f32 %v2061_v51, %v1336_v22  ;;  %v1746_v22 = vld [vmem:[%s2937_s15 + $0x20] sm:$0xff]  ;;  %s1849_s15 = sshll.u32 %s2104_s14, 4  ;;  %s1850_s15 = int_to_ptr.vmem [resolvable:$true] %s1849_s15 }
0x1384   :  { %p2081_p1 = scmp.lt.s32.totalorder %s1850_s15, %s1850_s15 }
0x13e3   :  { %v1434_v58 = vpop.permute.xlu0 %1433 }
0x13e4   :  { %v1436_v52 = vmul.f32 %v2061_v51, %v1434_v58 }
0x13e6   :  { %1438 = vrot.lane.b32.xlu1 %v1436_v52, %s2101_s2  ;;  %v1885_v52 = vld [vmem:[%s2938_s16] ss:$0 sm:$0xff]  ;;  %s2076_s16 = scalar_lea.vmem %s1850_s15, 32 }
0x13e7   :  { %p2077_p0 = scmp.ne.s32.totalorder %s1850_s15, %s2076_s16  ;;  %p2082_p2 = scmp.lt.s32.totalorder %s2076_s16, %s2076_s16 }
0x13e9   :  { %p2083_p3 = por %p2082_p2, %p2081_p1 }
0x13eb   :  { %p2084_p4 = pnand %p2083_p3, %p2077_p0 }
0x1458   :  { %v1439_v54 = vpop.permute.xlu1 %1438 }
0x1459   :  { %v1441_v16 = vadd.f32 %v1439_v54, %v1431_v53 }
0x145b   :  { %2062 = vtanh.f32 %v1441_v16 }
0x1468   :  { %v2063_v55 = vpop.eup %2062 }
0x1469   :  { %1444 = vrot.lane.b32.xlu0 %v2063_v55, %s2099_s4 }
0x14db   :  { %v1445_v56 = vpop.permute.xlu0 %1444 }
0x14dc   :  { %v1447_v18 = vmul.f32 %v2061_v51, %v1445_v56 }
0x14de   :  { %1449 = vrot.lane.b32.xlu1 %v1447_v18, %s2101_s2 }
0x1550   :  { %v1450_v57 = vpop.permute.xlu1 %1449 }
0x1551   :  { %1879 = vmatmul.mubr.msk.f32.vlgmr.msra.gmra.mxu1 %vm436_vm2, %v1450_v57 }
0x1552   :  { %1987 = vmatprep.mubr.msk.f32.mxu1 %vm2103_vm6, %v2098_v3  ;;  %1972 = vmatpush3.msra.mxu1 %v1660_v1 }
0x1553   :  { %1973 = vmatprep.subr.mxu1 %v2098_v3 }
0x1554   :  { %1974 = vmatpush3.msra.mxu1 %v1659_v2 }
0x1555   :  { %1975 = vmatprep.subr.mxu1 %v2098_v3 }
0x1556   :  { %1976 = vmatpush3.msra.mxu1 %v1658_v4 }
0x1557   :  { %1977 = vmatprep.subr.mxu1 %v2098_v3 }
0x1558   :  { %1978 = vmatpush3.msra.mxu1 %v1657_v26 }
0x1559   :  { %1979 = vmatprep.subr.mxu1 %v2098_v3 }
0x155a   :  { %1980 = vmatpush3.msra.mxu1 %v1656_v27 }
0x155b   :  { %1981 = vmatprep.subr.mxu1 %v2098_v3 }
0x155c   :  { %1982 = vmatpush3.msra.mxu1 %v1655_v33 }
0x155d   :  { %1983 = vmatprep.subr.mxu1 %v2098_v3 }
0x155e   :  { %1984 = vmatpush3.msra.mxu1 %v1654_v34 }
0x155f   :  { %1985 = vmatprep.subr.mxu1 %v2098_v3 }
0x1560   :  { %1986 = vmatpush3.msra.mxu1 %v1653_v35 }
0x1611   :  { %v1519_v59 = vpop.f32.mrf.mxu1 }
0x1613   :  { %v1521_v63 = vpop.f32.mrf.mxu1 }
0x1614   :  { %v1524_v5 = vsel %vm519_vm3, %v1519_v59, %v1521_v63 }
0x1615   :  { %v1530_v6 = vadd.f32 %v2762_v10, %v1524_v5  ;;  %v1571_v10 = vld [vmem:[%s2933_s11 + $0x38] sm:$0xff] }
0x1616   :  { %1953 = vmatpush3.msra.mxu0 %v1571_v10 }
0x1617   :  { %2064 = vtanh.f32 %v1530_v6  ;;  %v1880_v7 = vmul.f32 -1.442695, %v1530_v6  ;;  %1954 = vmatprep.subr.mxu0 %v2098_v3 }
0x1618   :  { %1955 = vmatpush3.msra.mxu0 %v1570_v17 }
0x1619   :  { %2066 = vpow2.f32 %v1880_v7  ;;  %1956 = vmatprep.subr.mxu0 %v2098_v3 }
0x161a   :  { %1957 = vmatpush3.msra.mxu0 %v1569_v20 }
0x161b   :  { %1958 = vmatprep.subr.mxu0 %v2098_v3 }
0x161c   :  { %1959 = vmatpush3.msra.mxu0 %v1568_v23 }
0x161d   :  { %1960 = vmatprep.subr.mxu0 %v2098_v3 }
0x161e   :  { %1961 = vmatpush3.msra.mxu0 %v1567_v24 }
0x161f   :  { %1962 = vmatprep.subr.mxu0 %v2098_v3 }
0x1620   :  { %1963 = vmatpush3.msra.mxu0 %v1566_v25 }
0x1621   :  { %1964 = vmatprep.subr.mxu0 %v2098_v3 }
0x1622   :  { %1965 = vmatpush3.msra.mxu0 %v1565_v61 }
0x1623   :  { %1966 = vmatprep.subr.mxu0 %v2098_v3 }
0x1624   :  { %v2065_v21 = vpop.eup %2064  ;;  %1967 = vmatpush3.msra.mxu0 %v1564_v0 }
0x1625   :  { %1540 = vrot.lane.b32.xlu0 %v2065_v21, %s2099_s4  ;;  %1990 = vmatprep.subr.mxu0 %v2098_v3 }
0x1626   :  { %v2067_v8 = vpop.eup %2066 }
0x1627   :  { %v1534_v9 = vadd.f32 1.0, %v2067_v8 }
0x1629   :  { %2068 = vrcp.f32 %v1534_v9 }
0x1636   :  { %v2069_v45 = vpop.eup %2068 }
0x1637   :  { %v1538_v13 = vmul.f32 %v2069_v45, %v1441_v16 }
0x1697   :  { %v1541_v11 = vpop.permute.xlu0 %1540 }
0x1698   :  { %v1543_v12 = vmul.f32 %v2069_v45, %v1541_v11 }
0x169a   :  { %1545 = vrot.lane.b32.xlu1 %v1543_v12, %s2101_s2 }
0x170c   :  { %v1546_v14 = vpop.permute.xlu1 %1545 }
0x170d   :  { %v1548_v15 = vadd.f32 %v1546_v14, %v1538_v13 }
0x170f   :  { %2070 = vtanh.f32 %v1548_v15 }
0x171c   :  { %v2071_v60 = vpop.eup %2070 }
0x171d   :  { %1551 = vrot.lane.b32.xlu0 %v2071_v60, %s2099_s4 }
0x1721   :  { %1560 = vrot.lane.b32.xlu0 %v1559_v62, %s2099_s4 }
0x178f   :  { %v1552_v28 = vpop.permute.xlu0 %1551 }
0x1790   :  { %v1554_v29 = vmul.f32 %v2069_v45, %v1552_v28 }
0x1792   :  { %1556 = vrot.lane.b32.xlu1 %v1554_v29, %s2101_s2 }
0x1793   :  { %v1561_v30 = vpop.permute.xlu0 %1560 }
0x1804   :  { %v1557_v31 = vpop.permute.xlu1 %1556 }
0x1805   :  { %v1563_v32 = vsel %vm436_vm2, %v1557_v31, %v1561_v30 }
0x1806   :  { %1969 = vmatmul.mubr.msk.f32.vlgmr.msra.gmra.mxu0 %vm353_vm1, %v1563_v32 }
0x1807   :  { %2006 = vmatprep.mubr.msk.f32.mxu0 %vm2103_vm6, %v2098_v3  ;;  %1991 = vmatpush3.msra.mxu0 %v1749_v36 }
0x1808   :  { %1992 = vmatprep.subr.mxu0 %v2098_v3 }
0x1809   :  { %1993 = vmatpush3.msra.mxu0 %v1748_v37 }
0x180a   :  { %1994 = vmatprep.subr.mxu0 %v2098_v3 }
0x180b   :  { %1995 = vmatpush3.msra.mxu0 %v1747_v38 }
0x180c   :  { %1996 = vmatprep.subr.mxu0 %v2098_v3 }
0x180d   :  { %1997 = vmatpush3.msra.mxu0 %v1746_v22 }
0x180e   :  { %1998 = vmatprep.subr.mxu0 %v2098_v3 }
0x180f   :  { %1999 = vmatpush3.msra.mxu0 %v1745_v39 }
0x1810   :  { %2000 = vmatprep.subr.mxu0 %v2098_v3 }
0x1811   :  { %2001 = vmatpush3.msra.mxu0 %v1744_v44 }
0x1812   :  { %2002 = vmatprep.subr.mxu0 %v2098_v3 }
0x1813   :  { %2003 = vmatpush3.msra.mxu0 %v1743_v46 }
0x1814   :  { %2004 = vmatprep.subr.mxu0 %v2098_v3 }
0x1815   :  { %2005 = vmatpush3.msra.mxu0 %v1742_v47 }
0x18c6   :  { %v1648_v40 = vpop.f32.mrf.mxu0 }
0x18c7   :  { %v1649_v43 = vadd.f32 %v1881_v19, %v1648_v40 }
0x18c8   :  { %v1970_v42 = vpop.f32.mrf.mxu0 }
0x18c9   :  { %v1652_v41 = vmax.f32 %v1649_v43, 0.0 }
0x18cb   :  { %1988 = vmatmul.mubr.msk.f32.vlgmr.msra.gmra.mxu1 %vm353_vm1, %v1652_v41 }
0x198b   :  { %v1737_v49 = vpop.f32.mrf.mxu1 }
0x198c   :  { %v1738_v50 = vadd.f32 %v1883_v48, %v1737_v49 }
0x198d   :  { %v1989_v51 = vpop.f32.mrf.mxu1 }
0x198e   :  { %v1741_v58 = vadd.f32 %v1738_v50, %v1563_v32 }
0x1990   :  { %2007 = vmatmul.mubr.msk.f32.vlgmr.msra.gmra.mxu0 %vm353_vm1, %v1741_v58 }
0x1a50   :  { %v1826_v3 = vpop.f32.mrf.mxu0 }
0x1a51   :  { %v1827_v53 = vadd.f32 %v1885_v52, %v1826_v3 }
0x1a52   :  { %v2008_v54 = vpop.f32.mrf.mxu0 }
0x1a53   :  { %v1831_v16 = vsel %vm1830_vm7, %v1827_v53, -inf }
0x1a54   :  { %1832 = vmax.xlane.f32.xlu1 %v1831_v16 }
0x1add   :  { %v1833_v55 = vpop.xlane.xlu1 %1832 }
0x1ade   :  { %v1834_v56 = vsub.f32 %v1827_v53, %v1833_v55 }
0x1ae0   :  { %v1835_v18 = vmul.f32 1.442695, %v1834_v56 }
0x1ae2   :  { %2072 = vpow2.f32 %v1835_v18 }
0x1aef   :  { %v2073_v57 = vpop.eup %2072 }
0x1af0   :  { %v1837_v59 = vsel %vm1830_vm7, %v2073_v57, 0.0 }
0x1af1   :  { %1838 = vadd.xlane.f32.xlu0 %v1837_v59 }
0x1b7a   :  { %v1839_v63 = vpop.xlane.xlu0 %1838 }
0x1b7b   :  { %2074 = vrcp.f32 %v1839_v63 }
0x1b88   :  { %v2075_v5 = vpop.eup %2074 }
0x1b89   :  { %v1841_v6 = vmul.f32 %v2075_v5, %v2073_v57 }
0x1b8b   :  { %1842 = vst.msk [vmem:[#allocation2] sm:$0x3] %vm1830_vm7, %v1841_v6 }
0x1b8c   :  { %2087 = shalt.err (!%p2084_p4)
}
0x1b8d   :  { %1852 = dma.vmem_to_hbm [thread:$0]  %s1850_s15, 32, %s2939_s17, [#allocation3]  }
0x1b8e   :  { %2096 = dma.done.wait [#allocation3], 32  }
0x1b8f   :  { %2097 = vsyncadd [#allocation3], 4294967264 }
0x1b90   :  { %1856 = vsyncpa [#allocation3], 1 }

</bundles_post_ra>
